<compile_context>
chip_gen: v7x
topology: tpu7x:2x2x1
jax: 0.10.0
libtpu: 0.0.40
codegen_flags: <defaults>
</compile_context>

<pallas_src>
from functools import partial

import jax
import jax.numpy as jnp
from jax.experimental import pallas as pl
from jax.experimental.pallas import tpu as pltpu


# ---------------------------------------------------------------------------
# Pallas kernel: similarity rows  sim[b, j] = <item_latent[b], item_embedding[j]>
# ---------------------------------------------------------------------------
def _sim_rows_kernel(lat_ref, emb_ref, out_ref):
    # lat_ref: [B_pad, D] f32 (resident), emb_ref: [tn, D] f32 tile,
    # out_ref: [B_pad, tn] f32 (lane-dense).
    # Cast to bf16 in-kernel (VPU, co-issues with the MXU slot) and contract
    # dim 1 of both operands so the transpose is consumed natively by the MXU.
    lat = lat_ref[...].astype(jnp.bfloat16)
    emb = emb_ref[...].astype(jnp.bfloat16)
    out_ref[...] = jax.lax.dot_general(
        lat, emb,
        dimension_numbers=(((1,), (1,)), ((), ())),
        preferred_element_type=jnp.float32)


def _pick_item_tile(num_items, batch_pad, latent_dim):
    """Largest lane-dense (multiple-of-128) item tile whose double-buffered
    working set stays well under the scoped-VMEM default, while keeping >= 2
    grid steps so the DMA pipeline / megacore sharding have work to split."""
    if num_items <= 128:
        return num_items  # full-extent block (allowed: equals full array dim)
    budget = 8 << 20  # conservative slice of the 16-32 MiB scoped-VMEM default
    for tn in (8192, 4096, 2048, 1024, 512, 256):
        if tn >= num_items:
            continue
        tile_bytes = 2 * (tn * latent_dim * 4 + batch_pad * tn * 4)  # dbl-buffered
        if tile_bytes <= budget:
            return tn
    return 128


def similarity_rows_pallas(item_latent, item_embedding):
    """[B, D] x [I, D]^T -> [B, I] (f32), tiled over I on the MXU."""
    B, D = item_latent.shape
    I, _ = item_embedding.shape

    # Pad batch rows to a sublane multiple; padded rows are zero (sim = 0) and
    # sliced off on return.
    B_pad = max(8, ((B + 7) // 8) * 8)
    lat = item_latent
    if B_pad != B:
        lat = jnp.pad(lat, ((0, B_pad - B), (0, 0)))

    tn = _pick_item_tile(I, B_pad, D)
    grid = (pl.cdiv(I, tn),)

    cost = pl.CostEstimate(
        flops=2 * B_pad * I * D,
        transcendentals=0,
        bytes_accessed=(B_pad * D + I * D) * 4 + B_pad * I * 4,
    )

    out = pl.pallas_call(
        _sim_rows_kernel,
        out_shape=jax.ShapeDtypeStruct((B_pad, I), jnp.float32),
        grid=grid,
        in_specs=[
            pl.BlockSpec((B_pad, D), lambda j: (0, 0)),   # query rows (VMEM-resident)
            pl.BlockSpec((tn, D), lambda j: (j, 0)),      # item-table tile
        ],
        out_specs=pl.BlockSpec((B_pad, tn), lambda j: (0, j)),  # lane-dense
        compiler_params=pltpu.CompilerParams(
            dimension_semantics=("parallel",)),
        cost_estimate=cost,
    )(lat, item_embedding)
    return out[:B] if B_pad != B else out


# ---------------------------------------------------------------------------
# Jitted functional forward (glue fuses around the pallas_call)
# ---------------------------------------------------------------------------
@partial(jax.jit, static_argnames=("num_items", "top_k"))
def _forward_impl(user_embedding, item_embedding, user_avg, movie_avg,
                  global_mean, lambda1, lambda2,
                  user_indices, item_indices, sp_rows, sp_cols, sp_vals,
                  *, num_items, top_k):
    # baseline biases
    user_bias = user_avg[user_indices] - global_mean
    item_bias = movie_avg[item_indices] - global_mean
    baseline = global_mean + user_bias + item_bias

    # embedding lookups (glue)
    user_latent = user_embedding[user_indices]    # [B, D] f32
    item_latent = item_embedding[item_indices]    # [B, D] f32

    # Only the B rows of the item-item similarity that are actually used:
    # sim_rows = item_latent @ item_embedding.T   (Pallas MXU, bf16 in / f32 acc)
    sim_rows = similarity_rows_pallas(item_latent, item_embedding)   # [B, I]

    # Residual column sums over users via O(nnz) segment-sum — equivalent to
    # building the dense (U, I) residual matrix and summing over dim 0.
    # TODO(synk): scatter-add has no clean Pallas TPU equivalent; plain JAX glue.
    residual_values = sp_vals.astype(jnp.float32) - (
        global_mean + user_avg[sp_rows] + movie_avg[sp_cols])
    colsum = jnp.zeros((num_items,), jnp.float32).at[sp_cols].add(
        residual_values)                                              # [I]

    # knn: top_k over the similarity rows of the requested items.
    # TODO(synk): torch.topk has no clean Pallas TPU equivalent; jax.lax.top_k glue.
    topk_vals, topk_idx = jax.lax.top_k(sim_rows, top_k)              # [B, K]
    residual_contrib = jnp.sum(topk_vals * colsum[topk_idx], axis=1)  # [B]

    # Prediction tail + regularization: tiny per-batch VPU work left to XLA
    # fusion (a grid=(1,) Pallas tail kernel is pure launch overhead).
    svd_score = jnp.sum(user_latent * item_latent, axis=1)            # [B]
    predictions = jnp.maximum(baseline + svd_score + residual_contrib, 0.0)
    regularization = (lambda1 * jnp.sum(user_latent ** 2)
                      + lambda2 * jnp.sum(item_latent ** 2))
    return predictions, regularization


# ---------------------------------------------------------------------------
# Model (JAX re-implementation of the PyTorch module's forward semantics)
# ---------------------------------------------------------------------------
class MatrixFactorization:
    def __init__(self, num_users, num_items, latent_dim,
                 user_ids, movie_ids, ratings,
                 top_k=256, lambda1=0.1, lambda2=0.1, key=None):
        self.num_users = num_users
        self.num_items = num_items
        self.top_k = top_k
        self.lambda1 = lambda1
        self.lambda2 = lambda2

        ratings = ratings.astype(jnp.float32)
        self.global_mean = float(jnp.mean(ratings))

        user_sum = jnp.zeros(num_users, jnp.float32).at[user_ids].add(ratings)
        user_cnt = jnp.zeros(num_users, jnp.float32).at[user_ids].add(1.0)
        self.user_avg = user_sum / jnp.maximum(user_cnt, 1.0)

        movie_sum = jnp.zeros(num_items, jnp.float32).at[movie_ids].add(ratings)
        movie_cnt = jnp.zeros(num_items, jnp.float32).at[movie_ids].add(1.0)
        self.movie_avg = movie_sum / jnp.maximum(movie_cnt, 1.0)

        k1, k2 = jax.random.split(key)
        # nn.init.normal_(weight, std=0.1)
        self.user_embedding = 0.1 * jax.random.normal(
            k1, (num_users, latent_dim), jnp.float32)
        self.item_embedding = 0.1 * jax.random.normal(
            k2, (num_items, latent_dim), jnp.float32)
        # The nn.Parameter `self.similarity` is never used in forward(); omitted.

    def forward(self, user_indices, item_indices, sp_rows, sp_cols, sp_vals):
        return _forward_impl(
            self.user_embedding, self.item_embedding,
            self.user_avg, self.movie_avg,
            self.global_mean, self.lambda1, self.lambda2,
            user_indices, item_indices, sp_rows, sp_cols, sp_vals,
            num_items=self.num_items, top_k=self.top_k)


# ---------------------------------------------------------------------------
if __name__ == "__main__":
    key = jax.random.PRNGKey(0)
    num_users, num_items, latent_dim = 64, 1024, 32
    top_k = 8
    batch = 8
    nnz = 2048

    k_flat, k_rate, k_emb, k_u, k_i = jax.random.split(key, 5)

    # synthetic sparse utility matrix: nnz unique (user, item, rating) triples
    flat = jax.random.choice(k_flat, num_users * num_items, (nnz,), replace=False)
    rows = (flat // num_items).astype(jnp.int32)
    cols = (flat % num_items).astype(jnp.int32)
    ratings = jnp.round(
        jax.random.uniform(k_rate, (nnz,), minval=0.5, maxval=5.0) * 2.0) / 2.0

    model = MatrixFactorization(num_users, num_items, latent_dim,
                                rows, cols, ratings,
                                top_k=top_k, lambda1=0.1, lambda2=0.1, key=k_emb)

    user_indices = jax.random.randint(k_u, (batch,), 0, num_users)
    item_indices = jax.random.randint(k_i, (batch,), 0, num_items)

    preds, reg = model.forward(user_indices, item_indices, rows, cols, ratings)
    jax.block_until_ready((preds, reg))
    assert preds.shape == (batch,) and preds.dtype == jnp.float32
    assert reg.shape == () and reg.dtype == jnp.float32
    print("KERNEL_OK")
</pallas_src>

<mosaic_0001>
module attributes {stable_mosaic.version = 11 : i64} {
  func.func private @main(%arg0: i32) attributes {dimension_semantics = [#tpu.dimension_semantics<core_parallel>], iteration_bounds = array<i64: 2>, tpu.core_type = #tpu.core_type<sc_scalar_subcore>, window_params = []} {
    return
  }
}

module attributes {stable_mosaic.version = 11 : i64} {
  func.func private @main(%arg0: i32) attributes {dimension_semantics = [#tpu.dimension_semantics<core_parallel>], iteration_bounds = array<i64: 2>, tpu.core_type = #tpu.core_type<sc_scalar_subcore>, window_params = []} {
    return
  }
}

module attributes {stable_mosaic.version = 11 : i64} {
  func.func @_sim_rows_kernel(%arg0: i32, %arg1: memref<8x32xf32, #tpu.memory_space<vmem>>, %arg2: memref<512x32xf32, #tpu.memory_space<vmem>>, %arg3: memref<8x512xf32, #tpu.memory_space<vmem>>) attributes {dimension_semantics = [#tpu.dimension_semantics<parallel>], iteration_bounds = array<i64: 2>, scalar_prefetch = 0 : i64, scratch_operands = 0 : i64, tpu.core_type = #tpu.core_type<tc>, window_params = [{pipeline_mode = #tpu.pipeline_mode<synchronous>, transform_indices = @transform_0, window_bounds = array<i64: 8, 32>}, {transform_indices = @transform_1, window_bounds = array<i64: 512, 32>}, {transform_indices = @transform_2, window_bounds = array<i64: 8, 512>}]} {
    %c0 = arith.constant 0 : index
    %c0_0 = arith.constant 0 : index
    %0 = vector.load %arg1[%c0, %c0_0] : memref<8x32xf32, #tpu.memory_space<vmem>>, vector<8x32xf32>
    %1 = arith.truncf %0 : vector<8x32xf32> to vector<8x32xbf16>
    %c0_1 = arith.constant 0 : index
    %c0_2 = arith.constant 0 : index
    %2 = vector.load %arg2[%c0_1, %c0_2] : memref<512x32xf32, #tpu.memory_space<vmem>>, vector<512x32xf32>
    %3 = arith.truncf %2 : vector<512x32xf32> to vector<512x32xbf16>
    %cst = arith.constant dense<0.000000e+00> : vector<8x512xf32>
    %4 = tpu.matmul %1, %3, %cst {dimension_numbers = #tpu.dot_dimension_numbers<[1], [1], [0], [0], [0, 0, 1, 0], [], []>} : vector<8x32xbf16>, vector<512x32xbf16>, vector<8x512xf32> -> vector<8x512xf32>
    %c0_3 = arith.constant 0 : index
    %c0_4 = arith.constant 0 : index
    %5 = vector.load %arg3[%c0_3, %c0_4] : memref<8x512xf32, #tpu.memory_space<vmem>>, vector<8x512xf32>
    tpu.vector_store %arg3[%c0_3, %c0_4], %4 {strides = array<i32>} : memref<8x512xf32, #tpu.memory_space<vmem>>, vector<8x512xf32>,
    return
  }
  func.func @transform_0(%arg0: i32) -> (i32, i32) {
    %c0_i32 = arith.constant 0 : i32
    %c0_i32_0 = arith.constant 0 : i32
    %c0_i32_1 = arith.constant 0 : i32
    return %c0_i32, %c0_i32_0 : i32, i32
  }
  func.func @transform_1(%arg0: i32) -> (i32, i32) {
    %c0_i32 = arith.constant 0 : i32
    %c0_i32_0 = arith.constant 0 : i32
    return %arg0, %c0_i32 : i32, i32
  }
  func.func @transform_2(%arg0: i32) -> (i32, i32) {
    %c0_i32 = arith.constant 0 : i32
    %c0_i32_0 = arith.constant 0 : i32
    return %c0_i32, %arg0 : i32, i32
  }
}

</mosaic_0001>

<bundles_post_ra>
// kernel: custom-call
= control target key start
LH: loop header
LB: loop body
LE: loop exit
PB: predicated region body
PF: predicated region fallthrough
CT: control target
= control target key end

     0   :  { %v1394_v0 = vmov 2147483648   ;;  %v1395_v1 = vmov 2147483647   ;;  %s1566_s0 = inlined_call_operand.vmem [shape: f32[8,1024], index: 0, kind: input, shape index: {}]   ;;  %s1567_s1 = inlined_call_operand.vmem [shape: f32[8,8], index: 1, kind: output, shape index: {0}]   ;;  %s1568_s2 = inlined_call_operand.vmem [shape: s32[8,8], index: 2, kind: output, shape index: {1}]  }
   0x1   :  { %6 = vst [vmem:[#allocation9] sm:$0xff] %v1394_v0  ;;  %7 = vst [vmem:[#allocation11] sm:$0xff] %v1395_v1 }
   0x2   :  { %v24_v2 = vld [vmem:[%s1566_s0] sm:$0xff]  ;;  %v26_v3 = vld [vmem:[%s1566_s0 + $0x8] sm:$0xff]  ;;  %v45_v4 = vlaneseq  ;;  %v28_v5 = vld [vmem:[%s1566_s0 + $0x10] sm:$0xff]  ;;  %v1396_v7 = vmov 2147483648   ;;  %v1397_v8 = vmov 2147483647  }
   0x3   :  { %v30_v6 = vld [vmem:[%s1566_s0 + $0x18] sm:$0xff]  ;;  %158 = vst [vmem:[#allocation10] sm:$0xff] %v1396_v7  ;;  %159 = vst [vmem:[#allocation12] sm:$0xff] %v1397_v8  ;;  %v32_v9 = vld [vmem:[%s1566_s0 + $0x20] sm:$0xff]  ;;  %v56_v12 = vsub.s32 2147483647, %v24_v2 }
   0x4   :  { %v34_v10 = vld [vmem:[%s1566_s0 + $0x28] sm:$0xff]  ;;  %v1437_v11 = vshrl.u32 %v45_v4, 7  ;;  %v36_v13 = vld [vmem:[%s1566_s0 + $0x30] sm:$0xff]  ;;  %v38_v14 = vld [vmem:[%s1566_s0 + $0x38] sm:$0xff]  ;;  %v46_v15 = vand.u32 127, %v45_v4  ;;  %vm55_vm0 = vcmp.lt.s32.totalorder %v24_v2, 0 }
   0x5   :  { %v65_v16 = vsub.s32 2147483647, %v26_v3  ;;  %vm64_vm1 = vcmp.lt.s32.totalorder %v26_v3, 0  ;;  %v74_v18 = vsub.s32 2147483647, %v28_v5  ;;  %vm73_vm2 = vcmp.lt.s32.totalorder %v28_v5, 0 }
   0x6   :  { %v49_v17 = vshrl.u32 %v1437_v11, 3  ;;  %v83_v19 = vsub.s32 2147483647, %v30_v6  ;;  %vm82_vm3 = vcmp.lt.s32.totalorder %v30_v6, 0  ;;  %v92_v20 = vsub.s32 2147483647, %v32_v9 }
   0x7   :  { %v101_v21 = vsub.s32 2147483647, %v34_v10  ;;  %vm91_vm4 = vcmp.lt.s32.totalorder %v32_v9, 0  ;;  %vm100_vm5 = vcmp.lt.s32.totalorder %v34_v10, 0  ;;  %vm109_vm6 = vcmp.lt.s32.totalorder %v36_v13, 0  ;;  %s1448_s0 = smov 0  }
   0x8   :  { %v51_v22 = vmul.u32 128, %v49_v17  ;;  %v57_v23 = vsel %vm55_vm0, %v56_v12, %v24_v2  ;;  %v110_v24 = vsub.s32 2147483647, %v36_v13  ;;  %vm118_vm7 = vcmp.lt.s32.totalorder %v38_v14, 0 }
   0x9   :  { %v119_v25 = vsub.s32 2147483647, %v38_v14  ;;  %v66_v27 = vsel %vm64_vm1, %v65_v16, %v26_v3  ;;  %v75_v28 = vsel %vm73_vm2, %v74_v18, %v28_v5  ;;  %v84_v29 = vsel %vm82_vm3, %v83_v19, %v30_v6 }
   0xa   :  { %v52_v26 = vadd.s32 %v51_v22, %v46_v15  ;;  %v93_v30 = vsel %vm91_vm4, %v92_v20, %v32_v9  ;;  %v102_v31 = vsel %vm100_vm5, %v101_v21, %v34_v10  ;;  %v111_v32 = vsel %vm109_vm6, %v110_v24, %v36_v13 }
   0xb   :  { %v120_v33 = vsel %vm118_vm7, %v119_v25, %v38_v14 }
   0xc   :  { %vm59_vm8 = vcmp.lt.s32.totalorder %v52_v26, 1024  ;;  %v67_v34 = vadd.s32 128, %v52_v26  ;;  %v76_v35 = vadd.s32 256, %v52_v26  ;;  %v85_v36 = vadd.s32 384, %v52_v26  ;;  %135 = vst [vmem:[#allocation14] sm:$0xff] %v52_v26 }
   0xd   :  { %v60_v37 = vsel %vm59_vm8, %v57_v23, 2147483648  ;;  %v94_v38 = vadd.s32 512, %v52_v26  ;;  %v103_v39 = vadd.s32 640, %v52_v26  ;;  %v112_v40 = vadd.s32 768, %v52_v26 }
   0xe   :  { %61 = vst [vmem:[#allocation13] sm:$0xff] %v60_v37  ;;  %vm68_vm9 = vcmp.lt.s32.totalorder %v67_v34, 1024  ;;  %vm77_vm10 = vcmp.lt.s32.totalorder %v76_v35, 1024  ;;  %vm86_vm11 = vcmp.lt.s32.totalorder %v85_v36, 1024  ;;  %v121_v41 = vadd.s32 896, %v52_v26  ;;  %138 = vst [vmem:[#allocation14 + $0x8] sm:$0xff] %v67_v34 }
   0xf   :  { %141 = vst [vmem:[#allocation14 + $0x10] sm:$0xff] %v76_v35  ;;  %144 = vst [vmem:[#allocation14 + $0x18] sm:$0xff] %v85_v36  ;;  %v69_v42 = vsel %vm68_vm9, %v66_v27, 2147483648  ;;  %v78_v43 = vsel %vm77_vm10, %v75_v28, 2147483648  ;;  %v87_v44 = vsel %vm86_vm11, %v84_v29, 2147483648  ;;  %vm95_vm12 = vcmp.lt.s32.totalorder %v94_v38, 1024 }
  0x10   :  { %147 = vst [vmem:[#allocation14 + $0x20] sm:$0xff] %v94_v38  ;;  %150 = vst [vmem:[#allocation14 + $0x28] sm:$0xff] %v103_v39  ;;  %v96_v45 = vsel %vm95_vm12, %v93_v30, 2147483648  ;;  %vm104_vm13 = vcmp.lt.s32.totalorder %v103_v39, 1024  ;;  %vm113_vm14 = vcmp.lt.s32.totalorder %v112_v40, 1024  ;;  %vm122_vm15 = vcmp.lt.s32.totalorder %v121_v41, 1024 }
  0x11   :  { %153 = vst [vmem:[#allocation14 + $0x30] sm:$0xff] %v112_v40  ;;  %70 = vst [vmem:[#allocation13 + $0x8] sm:$0xff] %v69_v42  ;;  %v105_v46 = vsel %vm104_vm13, %v102_v31, 2147483648  ;;  %v114_v47 = vsel %vm113_vm14, %v111_v32, 2147483648  ;;  %v123_v48 = vsel %vm122_vm15, %v120_v33, 2147483648 }
  0x12   :  { %79 = vst [vmem:[#allocation13 + $0x10] sm:$0xff] %v78_v43  ;;  %88 = vst [vmem:[#allocation13 + $0x18] sm:$0xff] %v87_v44 }
  0x13   :  { %156 = vst [vmem:[#allocation14 + $0x38] sm:$0xff] %v121_v41  ;;  %97 = vst [vmem:[#allocation13 + $0x20] sm:$0xff] %v96_v45 }
  0x14   :  { %106 = vst [vmem:[#allocation13 + $0x28] sm:$0xff] %v105_v46  ;;  %115 = vst [vmem:[#allocation13 + $0x30] sm:$0xff] %v114_v47 }
  0x15   :  { %124 = vst [vmem:[#allocation13 + $0x38] sm:$0xff] %v123_v48 }
  0x16 LB: > { %v167_v49 = vld [vmem:[#allocation13] sm:$0xff]  ;;  %v173_v52 = vld [vmem:[#allocation14 + $0x8] sm:$0xff]  ;;  %v186_v54 = vld [vmem:[#allocation14 + $0x10] sm:$0xff]  ;;  %s538_s25 = scalar_lea.vmem [#allocation10], %s1392_s0  ;;  %s540_s26 = scalar_lea.vmem [#allocation12], %s1392_s0  ;;  %s1392_s0 = sphi %s1448_s0, %s166_s0  }
  0x17   : > { %v168_v50 = vld [vmem:[#allocation14] sm:$0xff]  ;;  %v199_v58 = vld [vmem:[#allocation14 + $0x18] sm:$0xff]  ;;  %v225_v2 = vld [vmem:[#allocation14 + $0x28] sm:$0xff]  ;;  %s166_s0 = sadd.s32 1, %s1392_s0  }
  0x18   : > { %v171_v51 = vld [vmem:[#allocation13 + $0x8] sm:$0xff]  ;;  %vm177_vm2 = vcmp.lt.s32.totalorder %v173_v52, %v168_v50  ;;  %v212_v62 = vld [vmem:[#allocation14 + $0x20] sm:$0xff]  ;;  %v238_v7 = vld [vmem:[#allocation14 + $0x30] sm:$0xff]  ;;  %p163_p8 = scmp.ge.s32.totalorder %s166_s0, 8  }
  0x19   : > { %vm175_vm0 = vcmp.gt.s32.totalorder %v171_v51, %v167_v49  ;;  %vm176_vm1 = vcmp.eq.s32.totalorder %v171_v51, %v167_v49  ;;  %v184_v53 = vld [vmem:[#allocation13 + $0x10] sm:$0xff]  ;;  %v197_v57 = vld [vmem:[#allocation13 + $0x18] sm:$0xff] }
  0x1a   : > { %vm178_vm3 = vmand %vm176_vm1, %vm177_vm2  ;;  %v210_v61 = vld [vmem:[#allocation13 + $0x20] sm:$0xff]  ;;  %v251_v12 = vld [vmem:[#allocation14 + $0x38] sm:$0xff] }
  0x1b   : > { %vm179_vm4 = vmor %vm175_vm0, %vm178_vm3  ;;  %v223_v1 = vld [vmem:[#allocation13 + $0x28] sm:$0xff]  ;;  %v236_v6 = vld [vmem:[#allocation13 + $0x30] sm:$0xff] }
  0x1c   : > { %v180_v55 = vsel %vm179_vm4, %v171_v51, %v167_v49  ;;  %v181_v56 = vsel %vm179_vm4, %v173_v52, %v168_v50  ;;  %v249_v10 = vld [vmem:[#allocation13 + $0x38] sm:$0xff] }
  0x1d   : > { %vm188_vm5 = vcmp.gt.s32.totalorder %v184_v53, %v180_v55  ;;  %vm189_vm6 = vcmp.eq.s32.totalorder %v184_v53, %v180_v55  ;;  %vm190_vm7 = vcmp.lt.s32.totalorder %v186_v54, %v181_v56 }
  0x1e   : > { %vm191_vm8 = vmand %vm189_vm6, %vm190_vm7 }
  0x1f   : > { %vm192_vm9 = vmor %vm188_vm5, %vm191_vm8 }
  0x20   : > { %v193_v59 = vsel %vm192_vm9, %v184_v53, %v180_v55  ;;  %v194_v60 = vsel %vm192_vm9, %v186_v54, %v181_v56 }
  0x21   : > { %vm201_vm10 = vcmp.gt.s32.totalorder %v197_v57, %v193_v59  ;;  %vm202_vm11 = vcmp.eq.s32.totalorder %v197_v57, %v193_v59  ;;  %vm203_vm12 = vcmp.lt.s32.totalorder %v199_v58, %v194_v60 }
  0x22   : > { %vm204_vm13 = vmand %vm202_vm11, %vm203_vm12 }
  0x23   : > { %vm205_vm14 = vmor %vm201_vm10, %vm204_vm13 }
  0x24   : > { %v206_v63 = vsel %vm205_vm14, %v197_v57, %v193_v59  ;;  %v207_v0 = vsel %vm205_vm14, %v199_v58, %v194_v60 }
  0x25   : > { %vm214_vm15 = vcmp.gt.s32.totalorder %v210_v61, %v206_v63  ;;  %vm215_vm0 = vcmp.eq.s32.totalorder %v210_v61, %v206_v63  ;;  %vm216_vm1 = vcmp.lt.s32.totalorder %v212_v62, %v207_v0 }
  0x26   : > { %vm217_vm2 = vmand %vm215_vm0, %vm216_vm1 }
  0x27   : > { %vm218_vm3 = vmor %vm214_vm15, %vm217_vm2 }
  0x28   : > { %v219_v3 = vsel %vm218_vm3, %v210_v61, %v206_v63  ;;  %v220_v5 = vsel %vm218_vm3, %v212_v62, %v207_v0 }
  0x29   : > { %vm227_vm4 = vcmp.gt.s32.totalorder %v223_v1, %v219_v3  ;;  %vm228_vm5 = vcmp.eq.s32.totalorder %v223_v1, %v219_v3  ;;  %vm229_vm6 = vcmp.lt.s32.totalorder %v225_v2, %v220_v5 }
  0x2a   : > { %vm230_vm7 = vmand %vm228_vm5, %vm229_vm6 }
  0x2b   : > { %vm231_vm8 = vmor %vm227_vm4, %vm230_vm7 }
  0x2c   : > { %v232_v8 = vsel %vm231_vm8, %v223_v1, %v219_v3  ;;  %v233_v9 = vsel %vm231_vm8, %v225_v2, %v220_v5 }
  0x2d   : > { %vm240_vm9 = vcmp.gt.s32.totalorder %v236_v6, %v232_v8  ;;  %vm241_vm10 = vcmp.eq.s32.totalorder %v236_v6, %v232_v8  ;;  %vm242_vm11 = vcmp.lt.s32.totalorder %v238_v7, %v233_v9 }
  0x2e   : > { %vm243_vm12 = vmand %vm241_vm10, %vm242_vm11 }
  0x2f   : > { %vm244_vm13 = vmor %vm240_vm9, %vm243_vm12 }
  0x30   : > { %v245_v13 = vsel %vm244_vm13, %v236_v6, %v232_v8  ;;  %v246_v14 = vsel %vm244_vm13, %v238_v7, %v233_v9 }
  0x31   : > { %vm253_vm14 = vcmp.gt.s32.totalorder %v249_v10, %v245_v13  ;;  %vm254_vm15 = vcmp.eq.s32.totalorder %v249_v10, %v245_v13  ;;  %vm255_vm0 = vcmp.lt.s32.totalorder %v251_v12, %v246_v14 }
  0x32   : > { %vm256_vm1 = vmand %vm254_vm15, %vm255_vm0 }
  0x33   : > { %vm257_vm2 = vmor %vm253_vm14, %vm256_vm1 }
  0x34   : > { %v259_v15 = vsel %vm257_vm2, %v251_v12, %v246_v14  ;;  %v258_v16 = vsel %vm257_vm2, %v249_v10, %v245_v13 }
  0x35   : > { %293 = vxpose.xlu1.b32.start [1/16] %v259_v15, 128  ;;  %261 = vxpose.xlu0.b32.start [1/16] %v258_v16, 128 }
  0x39   : > { %294 = vxpose.xlu1.b32.cont [2/16] %v259_v15, 128  ;;  %262 = vxpose.xlu0.b32.cont [2/16] %v258_v16, 128 }
  0x3d   : > { %295 = vxpose.xlu1.b32.cont [3/16] %v259_v15, 128  ;;  %263 = vxpose.xlu0.b32.cont [3/16] %v258_v16, 128 }
  0x41   : > { %296 = vxpose.xlu1.b32.cont [4/16] %v259_v15, 128  ;;  %264 = vxpose.xlu0.b32.cont [4/16] %v258_v16, 128 }
  0x45   : > { %297 = vxpose.xlu1.b32.cont [5/16] %v259_v15, 128  ;;  %265 = vxpose.xlu0.b32.cont [5/16] %v258_v16, 128 }
  0x49   : > { %298 = vxpose.xlu1.b32.cont [6/16] %v259_v15, 128  ;;  %266 = vxpose.xlu0.b32.cont [6/16] %v258_v16, 128 }
  0x4d   : > { %299 = vxpose.xlu1.b32.cont [7/16] %v259_v15, 128  ;;  %267 = vxpose.xlu0.b32.cont [7/16] %v258_v16, 128 }
  0x51   : > { %300 = vxpose.xlu1.b32.cont [8/16] %v259_v15, 128  ;;  %268 = vxpose.xlu0.b32.cont [8/16] %v258_v16, 128 }
  0x55   : > { %301 = vxpose.xlu1.b32.cont [9/16] %v259_v15, 128  ;;  %269 = vxpose.xlu0.b32.cont [9/16] %v258_v16, 128 }
  0x59   : > { %302 = vxpose.xlu1.b32.cont [10/16] %v259_v15, 128  ;;  %270 = vxpose.xlu0.b32.cont [10/16] %v258_v16, 128 }
  0x5d   : > { %303 = vxpose.xlu1.b32.cont [11/16] %v259_v15, 128  ;;  %271 = vxpose.xlu0.b32.cont [11/16] %v258_v16, 128 }
  0x61   : > { %304 = vxpose.xlu1.b32.cont [12/16] %v259_v15, 128  ;;  %272 = vxpose.xlu0.b32.cont [12/16] %v258_v16, 128 }
  0x65   : > { %305 = vxpose.xlu1.b32.cont [13/16] %v259_v15, 128  ;;  %273 = vxpose.xlu0.b32.cont [13/16] %v258_v16, 128 }
  0x69   : > { %306 = vxpose.xlu1.b32.cont [14/16] %v259_v15, 128  ;;  %274 = vxpose.xlu0.b32.cont [14/16] %v258_v16, 128 }
  0x6d   : > { %307 = vxpose.xlu1.b32.cont [15/16] %v259_v15, 128  ;;  %275 = vxpose.xlu0.b32.cont [15/16] %v258_v16, 128 }
  0x71   : > { %308 = vxpose.xlu1.b32.end [16/16] %v259_v15, 128  ;;  %276 = vxpose.xlu0.b32.end [16/16] %v258_v16, 128 }
  0xb5   : > { %v309_v17 = vpop.trf.xlu1  ;;  %v277_v18 = vpop.trf.xlu0 }
  0xb9   : > { %v310_v19 = vpop.trf.xlu1  ;;  %v278_v20 = vpop.trf.xlu0 }
  0xba   : > { %vm329_vm3 = vcmp.lt.s32.totalorder %v310_v19, %v309_v17  ;;  %vm327_vm4 = vcmp.gt.s32.totalorder %v278_v20, %v277_v18  ;;  %vm328_vm5 = vcmp.eq.s32.totalorder %v278_v20, %v277_v18 }
  0xbb   : > { %vm330_vm6 = vmand %vm328_vm5, %vm329_vm3 }
  0xbc   : > { %vm331_vm7 = vmor %vm327_vm4, %vm330_vm6 }
  0xbd   : > { %v332_v21 = vsel %vm331_vm7, %v278_v20, %v277_v18  ;;  %v311_v22 = vpop.trf.xlu1  ;;  %v333_v23 = vsel %vm331_vm7, %v310_v19, %v309_v17  ;;  %v279_v24 = vpop.trf.xlu0 }
  0xbe   : > { %vm338_vm8 = vcmp.lt.s32.totalorder %v311_v22, %v333_v23  ;;  %vm336_vm9 = vcmp.gt.s32.totalorder %v279_v24, %v332_v21  ;;  %vm337_vm10 = vcmp.eq.s32.totalorder %v279_v24, %v332_v21 }
  0xbf   : > { %vm339_vm11 = vmand %vm337_vm10, %vm338_vm8 }
  0xc0   : > { %vm340_vm12 = vmor %vm336_vm9, %vm339_vm11 }
  0xc1   : > { %v341_v25 = vsel %vm340_vm12, %v279_v24, %v332_v21  ;;  %v312_v26 = vpop.trf.xlu1  ;;  %v342_v27 = vsel %vm340_vm12, %v311_v22, %v333_v23  ;;  %v280_v28 = vpop.trf.xlu0 }
  0xc2   : > { %vm347_vm13 = vcmp.lt.s32.totalorder %v312_v26, %v342_v27  ;;  %vm345_vm14 = vcmp.gt.s32.totalorder %v280_v28, %v341_v25  ;;  %vm346_vm15 = vcmp.eq.s32.totalorder %v280_v28, %v341_v25 }
  0xc3   : > { %vm348_vm0 = vmand %vm346_vm15, %vm347_vm13 }
  0xc4   : > { %vm349_vm1 = vmor %vm345_vm14, %vm348_vm0 }
  0xc5   : > { %v350_v29 = vsel %vm349_vm1, %v280_v28, %v341_v25  ;;  %v313_v30 = vpop.trf.xlu1  ;;  %v351_v31 = vsel %vm349_vm1, %v312_v26, %v342_v27  ;;  %v281_v32 = vpop.trf.xlu0 }
  0xc6   : > { %vm356_vm2 = vcmp.lt.s32.totalorder %v313_v30, %v351_v31  ;;  %vm354_vm3 = vcmp.gt.s32.totalorder %v281_v32, %v350_v29  ;;  %vm355_vm4 = vcmp.eq.s32.totalorder %v281_v32, %v350_v29 }
  0xc7   : > { %vm357_vm5 = vmand %vm355_vm4, %vm356_vm2 }
  0xc8   : > { %vm358_vm6 = vmor %vm354_vm3, %vm357_vm5 }
  0xc9   : > { %v359_v33 = vsel %vm358_vm6, %v281_v32, %v350_v29  ;;  %v314_v34 = vpop.trf.xlu1  ;;  %v360_v35 = vsel %vm358_vm6, %v313_v30, %v351_v31  ;;  %v282_v36 = vpop.trf.xlu0 }
  0xca   : > { %vm365_vm7 = vcmp.lt.s32.totalorder %v314_v34, %v360_v35  ;;  %vm363_vm8 = vcmp.gt.s32.totalorder %v282_v36, %v359_v33  ;;  %vm364_vm9 = vcmp.eq.s32.totalorder %v282_v36, %v359_v33 }
  0xcb   : > { %vm366_vm10 = vmand %vm364_vm9, %vm365_vm7 }
  0xcc   : > { %vm367_vm11 = vmor %vm363_vm8, %vm366_vm10 }
  0xcd   : > { %v368_v37 = vsel %vm367_vm11, %v282_v36, %v359_v33  ;;  %v315_v38 = vpop.trf.xlu1  ;;  %v369_v39 = vsel %vm367_vm11, %v314_v34, %v360_v35  ;;  %v283_v40 = vpop.trf.xlu0 }
  0xce   : > { %vm374_vm12 = vcmp.lt.s32.totalorder %v315_v38, %v369_v39  ;;  %vm372_vm13 = vcmp.gt.s32.totalorder %v283_v40, %v368_v37  ;;  %vm373_vm14 = vcmp.eq.s32.totalorder %v283_v40, %v368_v37 }
  0xcf   : > { %vm375_vm15 = vmand %vm373_vm14, %vm374_vm12 }
  0xd0   : > { %vm376_vm0 = vmor %vm372_vm13, %vm375_vm15 }
  0xd1   : > { %v377_v41 = vsel %vm376_vm0, %v283_v40, %v368_v37  ;;  %v316_v42 = vpop.trf.xlu1  ;;  %v378_v43 = vsel %vm376_vm0, %v315_v38, %v369_v39  ;;  %v284_v44 = vpop.trf.xlu0 }
  0xd2   : > { %vm383_vm1 = vcmp.lt.s32.totalorder %v316_v42, %v378_v43  ;;  %vm381_vm2 = vcmp.gt.s32.totalorder %v284_v44, %v377_v41  ;;  %vm382_vm3 = vcmp.eq.s32.totalorder %v284_v44, %v377_v41 }
  0xd3   : > { %vm384_vm4 = vmand %vm382_vm3, %vm383_vm1 }
  0xd4   : > { %vm385_vm5 = vmor %vm381_vm2, %vm384_vm4 }
  0xd5   : > { %v386_v45 = vsel %vm385_vm5, %v284_v44, %v377_v41  ;;  %v317_v46 = vpop.trf.xlu1  ;;  %v387_v47 = vsel %vm385_vm5, %v316_v42, %v378_v43  ;;  %v285_v48 = vpop.trf.xlu0 }
  0xd6   : > { %vm392_vm6 = vcmp.lt.s32.totalorder %v317_v46, %v387_v47  ;;  %vm390_vm7 = vcmp.gt.s32.totalorder %v285_v48, %v386_v45  ;;  %vm391_vm8 = vcmp.eq.s32.totalorder %v285_v48, %v386_v45 }
  0xd7   : > { %vm393_vm9 = vmand %vm391_vm8, %vm392_vm6 }
  0xd8   : > { %vm394_vm10 = vmor %vm390_vm7, %vm393_vm9 }
  0xd9   : > { %v395_v49 = vsel %vm394_vm10, %v285_v48, %v386_v45  ;;  %v318_v50 = vpop.trf.xlu1  ;;  %v396_v51 = vsel %vm394_vm10, %v317_v46, %v387_v47  ;;  %v286_v52 = vpop.trf.xlu0 }
  0xda   : > { %vm401_vm11 = vcmp.lt.s32.totalorder %v318_v50, %v396_v51  ;;  %vm399_vm12 = vcmp.gt.s32.totalorder %v286_v52, %v395_v49  ;;  %vm400_vm13 = vcmp.eq.s32.totalorder %v286_v52, %v395_v49 }
  0xdb   : > { %vm402_vm14 = vmand %vm400_vm13, %vm401_vm11 }
  0xdc   : > { %vm403_vm15 = vmor %vm399_vm12, %vm402_vm14 }
  0xdd   : > { %v404_v53 = vsel %vm403_vm15, %v286_v52, %v395_v49  ;;  %v319_v54 = vpop.trf.xlu1  ;;  %v405_v55 = vsel %vm403_vm15, %v318_v50, %v396_v51  ;;  %v287_v56 = vpop.trf.xlu0 }
  0xde   : > { %vm410_vm0 = vcmp.lt.s32.totalorder %v319_v54, %v405_v55  ;;  %vm408_vm1 = vcmp.gt.s32.totalorder %v287_v56, %v404_v53  ;;  %vm409_vm2 = vcmp.eq.s32.totalorder %v287_v56, %v404_v53 }
  0xdf   : > { %vm411_vm3 = vmand %vm409_vm2, %vm410_vm0 }
  0xe0   : > { %vm412_vm4 = vmor %vm408_vm1, %vm411_vm3 }
  0xe1   : > { %v413_v57 = vsel %vm412_vm4, %v287_v56, %v404_v53  ;;  %v320_v58 = vpop.trf.xlu1  ;;  %v414_v59 = vsel %vm412_vm4, %v319_v54, %v405_v55  ;;  %v288_v60 = vpop.trf.xlu0  ;;  %v1398_v54 = vmov 2147483648   ;;  %v1399_v55 = vmov 2147483647  }
  0xe2   : > { %vm419_vm5 = vcmp.lt.s32.totalorder %v320_v58, %v414_v59  ;;  %vm417_vm6 = vcmp.gt.s32.totalorder %v288_v60, %v413_v57  ;;  %vm418_vm7 = vcmp.eq.s32.totalorder %v288_v60, %v413_v57 }
  0xe3   : > { %vm420_vm8 = vmand %vm418_vm7, %vm419_vm5 }
  0xe4   : > { %vm421_vm9 = vmor %vm417_vm6, %vm420_vm8 }
  0xe5   : > { %v422_v61 = vsel %vm421_vm9, %v288_v60, %v413_v57  ;;  %v321_v62 = vpop.trf.xlu1  ;;  %v423_v63 = vsel %vm421_vm9, %v320_v58, %v414_v59  ;;  %v289_v0 = vpop.trf.xlu0 }
  0xe6   : > { %vm428_vm10 = vcmp.lt.s32.totalorder %v321_v62, %v423_v63  ;;  %vm426_vm11 = vcmp.gt.s32.totalorder %v289_v0, %v422_v61  ;;  %vm427_vm12 = vcmp.eq.s32.totalorder %v289_v0, %v422_v61 }
  0xe7   : > { %vm429_vm13 = vmand %vm427_vm12, %vm428_vm10 }
  0xe8   : > { %vm430_vm14 = vmor %vm426_vm11, %vm429_vm13 }
  0xe9   : > { %v431_v1 = vsel %vm430_vm14, %v289_v0, %v422_v61  ;;  %v322_v2 = vpop.trf.xlu1  ;;  %v432_v3 = vsel %vm430_vm14, %v321_v62, %v423_v63  ;;  %v290_v5 = vpop.trf.xlu0 }
  0xea   : > { %vm437_vm15 = vcmp.lt.s32.totalorder %v322_v2, %v432_v3  ;;  %vm435_vm0 = vcmp.gt.s32.totalorder %v290_v5, %v431_v1  ;;  %vm436_vm1 = vcmp.eq.s32.totalorder %v290_v5, %v431_v1 }
  0xeb   : > { %vm438_vm2 = vmand %vm436_vm1, %vm437_vm15 }
  0xec   : > { %vm439_vm3 = vmor %vm435_vm0, %vm438_vm2 }
  0xed   : > { %v440_v6 = vsel %vm439_vm3, %v290_v5, %v431_v1  ;;  %v323_v7 = vpop.trf.xlu1  ;;  %v441_v8 = vsel %vm439_vm3, %v322_v2, %v432_v3  ;;  %v291_v9 = vpop.trf.xlu0 }
  0xee   : > { %vm446_vm4 = vcmp.lt.s32.totalorder %v323_v7, %v441_v8  ;;  %vm444_vm5 = vcmp.gt.s32.totalorder %v291_v9, %v440_v6  ;;  %vm445_vm6 = vcmp.eq.s32.totalorder %v291_v9, %v440_v6 }
  0xef   : > { %vm447_vm7 = vmand %vm445_vm6, %vm446_vm4 }
  0xf0   : > { %vm448_vm8 = vmor %vm444_vm5, %vm447_vm7 }
  0xf1   : > { %v449_v10 = vsel %vm448_vm8, %v291_v9, %v440_v6  ;;  %v324_v12 = vpop.trf.xlu1  ;;  %v450_v13 = vsel %vm448_vm8, %v323_v7, %v441_v8  ;;  %v292_v14 = vpop.trf.xlu0  ;;  %v780_v9 = vld [vmem:[#allocation9] sm:$0xff] (%p163_p8) }
  0xf2   : > { %vm455_vm9 = vcmp.lt.s32.totalorder %v324_v12, %v450_v13  ;;  %vm453_vm10 = vcmp.gt.s32.totalorder %v292_v14, %v449_v10  ;;  %vm454_vm11 = vcmp.eq.s32.totalorder %v292_v14, %v449_v10 }
  0xf3   : > { %vm456_vm12 = vmand %vm454_vm11, %vm455_vm9 }
  0xf4   : > { %vm457_vm13 = vmor %vm453_vm10, %vm456_vm12 }
  0xf5   : > { %v458_v15 = vsel %vm457_vm13, %v292_v14, %v449_v10  ;;  %v459_v16 = vsel %vm457_vm13, %v324_v12, %v450_v13  ;;  %v781_v10 = vld [vmem:[#allocation11] sm:$0xff] (%p163_p8)  ;;  %v1400_v12 = vmov (%p163_p8), 839939668   ;;  %v1401_v14 = vmov (%p163_p8), 1417023538  }
  0xf6   : > { %v461_v17 = vrot.slane %v458_v15, 1  ;;  %v462_v18 = vrot.slane %v459_v16, 1  ;;  %v805_v13 = vunpack.c.l.s4 (%p163_p8), %v1400_v12 }
  0xf8   : > { %vm464_vm14 = vcmp.gt.s32.totalorder %v461_v17, %v458_v15  ;;  %vm465_vm15 = vcmp.eq.s32.totalorder %v461_v17, %v458_v15  ;;  %vm466_vm0 = vcmp.lt.s32.totalorder %v462_v18, %v459_v16 }
  0xf9   : > { %vm467_vm1 = vmand %vm465_vm15, %vm466_vm0 }
  0xfa   : > { %vm468_vm2 = vmor %vm464_vm14, %vm467_vm1 }
  0xfb   : > { %v469_v19 = vsel %vm468_vm2, %v461_v17, %v458_v15  ;;  %v470_v20 = vsel %vm468_vm2, %v462_v18, %v459_v16  ;;  %v833_v15 = vunpack.c.l.s4 (%p163_p8), %v1401_v14  ;;  %v806_v16 = vunpack.c.0.s8 (%p163_p8), %v805_v13 }
  0xfc   : > { %v472_v21 = vrot.slane %v469_v19, 1  ;;  %v473_v22 = vrot.slane %v470_v20, 1 }
  0xfe   : > { %vm475_vm3 = vcmp.gt.s32.totalorder %v472_v21, %v469_v19  ;;  %vm476_vm4 = vcmp.eq.s32.totalorder %v472_v21, %v469_v19  ;;  %vm477_vm5 = vcmp.lt.s32.totalorder %v473_v22, %v470_v20 }
  0xff   : > { %vm478_vm6 = vmand %vm476_vm4, %vm477_vm5 }
 0x100   : > { %vm479_vm7 = vmor %vm475_vm3, %vm478_vm6 }
 0x101   : > { %v480_v23 = vsel %vm479_vm7, %v472_v21, %v469_v19  ;;  %v481_v24 = vsel %vm479_vm7, %v473_v22, %v470_v20  ;;  %v826_v20 = vand.u32 (%p163_p8), 4, %v1437_v11  ;;  %v834_v22 = vunpack.c.0.s8 (%p163_p8), %v833_v15 }
 0x102   : > { %v483_v25 = vrot.slane %v480_v23, 1  ;;  %v484_v26 = vrot.slane %v481_v24, 1 }
 0x104   : > { %vm488_vm8 = vcmp.lt.s32.totalorder %v484_v26, %v481_v24  ;;  %vm486_vm9 = vcmp.gt.s32.totalorder %v483_v25, %v480_v23  ;;  %vm487_vm10 = vcmp.eq.s32.totalorder %v483_v25, %v480_v23 }
 0x105   : > { %vm489_vm11 = vmand %vm487_vm10, %vm488_vm8 }
 0x106   : > { %vm490_vm12 = vmor %vm486_vm9, %vm489_vm11 }
 0x107   : > { %v491_v27 = vsel %vm490_vm12, %v483_v25, %v480_v23  ;;  %v492_v28 = vsel %vm490_vm12, %v484_v26, %v481_v24 }
 0x108   : > { %v494_v29 = vrot.slane %v491_v27, 1  ;;  %v495_v30 = vrot.slane %v492_v28, 1 }
 0x10a   : > { %vm497_vm13 = vcmp.gt.s32.totalorder %v494_v29, %v491_v27  ;;  %vm498_vm14 = vcmp.eq.s32.totalorder %v494_v29, %v491_v27  ;;  %vm499_vm15 = vcmp.lt.s32.totalorder %v495_v30, %v492_v28 }
 0x10b   : > { %vm500_vm0 = vmand %vm498_vm14, %vm499_vm15 }
 0x10c   : > { %vm501_vm1 = vmor %vm497_vm13, %vm500_vm0 }
 0x10d   : > { %v502_v31 = vsel %vm501_vm1, %v494_v29, %v491_v27  ;;  %v503_v32 = vsel %vm501_vm1, %v495_v30, %v492_v28  ;;  %v1402_v28 = vmov (%p163_p8), 1732584193   ;;  %v1501_v30 = vsub.s32 (%p163_p8), %v834_v22, %v1437_v11 }
 0x10e   : > { %v505_v33 = vrot.slane %v502_v31, 1  ;;  %v506_v34 = vrot.slane %v503_v32, 1  ;;  %v861_v29 = vunpack.c.l.s4 (%p163_p8), %v1402_v28 }
 0x110   : > { %vm508_vm2 = vcmp.gt.s32.totalorder %v505_v33, %v502_v31  ;;  %vm509_vm3 = vcmp.eq.s32.totalorder %v505_v33, %v502_v31  ;;  %vm510_vm4 = vcmp.lt.s32.totalorder %v506_v34, %v503_v32 }
 0x111   : > { %vm511_vm5 = vmand %vm509_vm3, %vm510_vm4 }
 0x112   : > { %vm512_vm6 = vmor %vm508_vm2, %vm511_vm5 }
 0x113   : > { %v513_v35 = vsel %vm512_vm6, %v505_v33, %v502_v31  ;;  %v514_v36 = vsel %vm512_vm6, %v506_v34, %v503_v32  ;;  %v854_v31 = vand.u32 (%p163_p8), 2, %v1437_v11  ;;  %v862_v34 = vunpack.c.0.s8 (%p163_p8), %v861_v29 }
 0x114   : > { %v516_v37 = vrot.slane %v513_v35, 1  ;;  %v517_v38 = vrot.slane %v514_v36, 1 }
 0x116   : > { %vm519_vm7 = vcmp.gt.s32.totalorder %v516_v37, %v513_v35  ;;  %vm520_vm8 = vcmp.eq.s32.totalorder %v516_v37, %v513_v35  ;;  %vm521_vm9 = vcmp.lt.s32.totalorder %v517_v38, %v514_v36 }
 0x117   : > { %vm522_vm10 = vmand %vm520_vm8, %vm521_vm9 }
 0x118   : > { %vm523_vm11 = vmor %vm519_vm7, %vm522_vm10 }
 0x119   : > { %v524_v39 = vsel %vm523_vm11, %v516_v37, %v513_v35  ;;  %v525_v40 = vsel %vm523_vm11, %v517_v38, %v514_v36 }
 0x11a   : > { %v527_v41 = vrot.slane %v524_v39, 1  ;;  %v528_v42 = vrot.slane %v525_v40, 1 }
 0x11c   : > { %vm530_vm12 = vcmp.gt.s32.totalorder %v527_v41, %v524_v39  ;;  %vm531_vm13 = vcmp.eq.s32.totalorder %v527_v41, %v524_v39  ;;  %vm532_vm14 = vcmp.lt.s32.totalorder %v528_v42, %v525_v40 }
 0x11d   : > { %vm533_vm15 = vmand %vm531_vm13, %vm532_vm14  ;;  %vm1495_vm14 = vcmp.ne.s32.totalorder (%p163_p8), %v826_v20, 0 }
 0x11e   : > { %vm534_vm0 = vmor %vm530_vm12, %vm533_vm15 }
 0x11f   : > { %v536_v43 = vsel %vm534_vm0, %v528_v42, %v525_v40  ;;  %v535_v44 = vsel %vm534_vm0, %v527_v41, %v524_v39  ;;  %v1515_v39 = vsub.s32 (%p163_p8), %v862_v34, %v1437_v11 }
 0x120   : > { %543 = vxpose.xlu0.b32.start.end [1/1] (short) (narrow) %v536_v43, 8  ;;  %539 = vst [vmem:[%s538_s25] sm:$0x1] %v535_v44  ;;  %541 = vst [vmem:[%s540_s26] sm:$0x1] %v536_v43  ;;  %v882_v43 = vand.u32 (%p163_p8), 1, %v1437_v11 }
 0x127   :  { %v768_v7 = vld [vmem:[#allocation10 + $0x7] ss:$-1 sm:$0xff] (%p163_p8)  ;;  %v774_v8 = vld [vmem:[#allocation12 + $0x7] ss:$-1 sm:$0xff] (%p163_p8) }
 0x128   :  { %vm786_vm9 = vcmp.gt.s32.totalorder (%p163_p8), %v780_v9, %v768_v7  ;;  %vm787_vm10 = vcmp.eq.s32.totalorder (%p163_p8), %v780_v9, %v768_v7  ;;  %vm788_vm11 = vcmp.lt.s32.totalorder (%p163_p8), %v781_v10, %v774_v8 }
 0x129   :  { %vm789_vm12 = vmand (%p163_p8), %vm787_vm10, %vm788_vm11  ;;  %vm1508_vm10 = vcmp.ne.s32.totalorder (%p163_p8), %v854_v31, 0 }
 0x12a   :  { %vm790_vm13 = vmor (%p163_p8), %vm786_vm9, %vm789_vm12 }
 0x12b   :  { %v791_v17 = vsel (%p163_p8), %vm790_vm13, %v780_v9, %v768_v7  ;;  %v793_v18 = vsel (%p163_p8), %vm790_vm13, %v768_v7, %v780_v9  ;;  %v795_v19 = vsel (%p163_p8), %vm790_vm13, %v781_v10, %v774_v8  ;;  %v797_v21 = vsel (%p163_p8), %vm790_vm13, %v774_v8, %v781_v10 }
 0x1a0   : > { %v559_v45 = vpop.trf.xlu0 }
 0x1a1   : > { %v598_v46 = vrot.slane %v559_v45, 1  ;;  %1352 = vpush %v559_v45 }
 0x1a3   : > { %1354 = vpush %v598_v46  ;;  %v622_v47 = vrot.slane %v598_v46, 1 }
 0x1a5   : > { %1356 = vpush %v622_v47  ;;  %v646_v48 = vrot.slane %v622_v47, 1 }
 0x1a7   : > { %1358 = vpush %v646_v48  ;;  %v670_v49 = vrot.slane %v646_v48, 1 }
 0x1a9   : > { %1360 = vpush %v670_v49  ;;  %v694_v50 = vrot.slane %v670_v49, 1 }
 0x1ab   : > { %1362 = vpush %v694_v50  ;;  %v718_v51 = vrot.slane %v694_v50, 1 }
 0x1ad   : > { %1364 = vpush %v718_v51  ;;  %v742_v52 = vrot.slane %v718_v51, 1 }
 0x1af   : > { %1366 = vpush %v742_v52 }
 0x1d2   : > { %s1353_s27 = spop %1352 }
 0x1d3   : > { %s576_s28 = sshrl.u32 %s1353_s27, 7  ;;  %s578_s29 = ssub.s32 0, %s1353_s27 }
 0x1d4   : > { %s1322_s30 = sshll.u32 %s576_s28, 3  ;;  %p577_p0 = scmp.lt.s32.totalorder %s1353_s27, 0 }
 0x1d5   : > { %s1320_s3 = smin.u32 %s1353_s27, %s578_s29  ;;  %s1355_s6 = spop %1354 }
 0x1d6   : > { %s580_s4 = sand.u32 127, %s1320_s3   ;;  %s600_s7 = sshrl.u32 %s1355_s6, 7 }
 0x1d7   : > { %s581_s5 = ssub.s32 0, %s580_s4  ;;  %s602_s11 = ssub.s32 0, %s1355_s6 }
 0x1d8   : > { %s1576_s5 = smov (!%p577_p0, %s581_s5), %s580_s4  ;;  %s1324_s13 = smin.u32 %s1355_s6, %s602_s11 }
 0x1d9   : > { %s583_s8 = sshrl.u32 %s1576_s5, 7  ;;  %s585_s9 = sand.u32 127, %s1576_s5  }
 0x1da   : > { %s1321_s10 = sshll.u32 %s583_s8, 10  ;;  %p601_p1 = scmp.lt.s32.totalorder %s1355_s6, 0 }
 0x1db   : > { %s586_s12 = sadd.s32 %s1321_s10, %s585_s9  ;;  %s604_s14 = sand.u32 127, %s1324_s13  }
 0x1dc   : > { %v588_v53 = vstv %s586_s12  ;;  %s605_s15 = ssub.s32 0, %s604_s14  ;;  %s1326_s16 = sshll.u32 %s600_s7, 3 }
 0x1dd   : > { %vm590_vm1 = vcmp.eq.s32.totalorder %v45_v4, %v588_v53  ;;  %s592_s17 = scalar_lea.vmem [#allocation13], %s1322_s30  ;;  %s595_s18 = scalar_lea.vmem [#allocation14], %s1322_s30 }
 0x1de   : > { %593 = vst.msk [vmem:[%s592_s17] sm:$0xff] %vm590_vm1, %v1398_v54  ;;  %596 = vst.msk [vmem:[%s595_s18] sm:$0xff] %vm590_vm1, %v1399_v55  ;;  %s1578_s15 = smov (!%p601_p1, %s605_s15), %s604_s14  ;;  %s1357_s19 = spop %1356 }
 0x1df   : > { %s607_s20 = sshrl.u32 %s1578_s15, 7  ;;  %s609_s21 = sand.u32 127, %s1578_s15  }
 0x1e0   : > { %s1325_s22 = sshll.u32 %s607_s20, 10  ;;  %s624_s24 = sshrl.u32 %s1357_s19, 7 }
 0x1e1   : > { %s610_s23 = sadd.s32 %s1325_s22, %s609_s21  ;;  %s626_s25 = ssub.s32 0, %s1357_s19 }
 0x1e2   : > { %v612_v56 = vstv %s610_s23  ;;  %p625_p2 = scmp.lt.s32.totalorder %s1357_s19, 0  ;;  %s1328_s26 = smin.u32 %s1357_s19, %s626_s25 }
 0x1e3   : > { %v613_v57 = vadd.s32 128, %v612_v56  ;;  %s628_s27 = sand.u32 127, %s1328_s26   ;;  %s1330_s28 = sshll.u32 %s624_s24, 3 }
 0x1e4   : > { %s629_s29 = ssub.s32 0, %s628_s27  ;;  %s1359_s30 = spop %1358 }
 0x1e5   : > { %vm614_vm2 = vcmp.eq.s32.totalorder %v45_v4, %v613_v57  ;;  %s616_s3 = scalar_lea.vmem [#allocation13], %s1326_s16  ;;  %s619_s4 = scalar_lea.vmem [#allocation14], %s1326_s16 }
 0x1e6   : > { %617 = vst.msk [vmem:[%s616_s3] sm:$0xff] %vm614_vm2, %v1398_v54  ;;  %620 = vst.msk [vmem:[%s619_s4] sm:$0xff] %vm614_vm2, %v1399_v55  ;;  %s1580_s29 = smov (!%p625_p2, %s629_s29), %s628_s27  ;;  %s648_s5 = sshrl.u32 %s1359_s30, 7 }
 0x1e7   : > { %s631_s6 = sshrl.u32 %s1580_s29, 7  ;;  %s633_s7 = sand.u32 127, %s1580_s29  }
 0x1e8   : > { %s1329_s8 = sshll.u32 %s631_s6, 10  ;;  %s650_s9 = ssub.s32 0, %s1359_s30 }
 0x1e9   : > { %s634_s10 = sadd.s32 %s1329_s8, %s633_s7  ;;  %s1332_s11 = smin.u32 %s1359_s30, %s650_s9 }
 0x1ea   : > { %v636_v58 = vstv %s634_s10  ;;  %p649_p3 = scmp.lt.s32.totalorder %s1359_s30, 0  ;;  %s652_s12 = sand.u32 127, %s1332_s11  }
 0x1eb   : > { %v637_v59 = vadd.s32 256, %v636_v58  ;;  %s653_s13 = ssub.s32 0, %s652_s12  ;;  %s1334_s14 = sshll.u32 %s648_s5, 3 }
 0x1ec   : > { %s1582_s13 = smov (!%p649_p3, %s653_s13), %s652_s12  ;;  %s1361_s15 = spop %1360 }
 0x1ed   : > { %vm638_vm3 = vcmp.eq.s32.totalorder %v45_v4, %v637_v59  ;;  %s640_s16 = scalar_lea.vmem [#allocation13], %s1330_s28  ;;  %s643_s17 = scalar_lea.vmem [#allocation14], %s1330_s28 }
 0x1ee   : > { %641 = vst.msk [vmem:[%s640_s16] sm:$0xff] %vm638_vm3, %v1398_v54  ;;  %644 = vst.msk [vmem:[%s643_s17] sm:$0xff] %vm638_vm3, %v1399_v55  ;;  %s655_s18 = sshrl.u32 %s1582_s13, 7  ;;  %s657_s19 = sand.u32 127, %s1582_s13  }
 0x1ef   : > { %s1333_s20 = sshll.u32 %s655_s18, 10  ;;  %s672_s22 = sshrl.u32 %s1361_s15, 7 }
 0x1f0   : > { %s658_s21 = sadd.s32 %s1333_s20, %s657_s19  ;;  %s674_s23 = ssub.s32 0, %s1361_s15 }
 0x1f1   : > { %v660_v60 = vstv %s658_s21  ;;  %p673_p4 = scmp.lt.s32.totalorder %s1361_s15, 0  ;;  %s1336_s24 = smin.u32 %s1361_s15, %s674_s23 }
 0x1f2   : > { %v661_v61 = vadd.s32 384, %v660_v60  ;;  %s676_s25 = sand.u32 127, %s1336_s24   ;;  %s1338_s26 = sshll.u32 %s672_s22, 3 }
 0x1f3   : > { %s677_s27 = ssub.s32 0, %s676_s25  ;;  %s1363_s29 = spop %1362 }
 0x1f4   : > { %vm662_vm4 = vcmp.eq.s32.totalorder %v45_v4, %v661_v61  ;;  %s664_s30 = scalar_lea.vmem [#allocation13], %s1334_s14  ;;  %s667_s28 = scalar_lea.vmem [#allocation14], %s1334_s14 }
 0x1f5   : > { %665 = vst.msk [vmem:[%s664_s30] sm:$0xff] %vm662_vm4, %v1398_v54  ;;  %668 = vst.msk [vmem:[%s667_s28] sm:$0xff] %vm662_vm4, %v1399_v55  ;;  %s1584_s27 = smov (!%p673_p4, %s677_s27), %s676_s25  ;;  %s696_s3 = sshrl.u32 %s1363_s29, 7 }
 0x1f6   : > { %s679_s4 = sshrl.u32 %s1584_s27, 7  ;;  %s681_s5 = sand.u32 127, %s1584_s27  }
 0x1f7   : > { %s1337_s6 = sshll.u32 %s679_s4, 10  ;;  %s698_s7 = ssub.s32 0, %s1363_s29 }
 0x1f8   : > { %s682_s8 = sadd.s32 %s1337_s6, %s681_s5  ;;  %s1340_s9 = smin.u32 %s1363_s29, %s698_s7 }
 0x1f9   : > { %v684_v62 = vstv %s682_s8  ;;  %p697_p5 = scmp.lt.s32.totalorder %s1363_s29, 0  ;;  %s700_s10 = sand.u32 127, %s1340_s9  }
 0x1fa   : > { %v685_v63 = vadd.s32 512, %v684_v62  ;;  %s701_s11 = ssub.s32 0, %s700_s10  ;;  %s1342_s12 = sshll.u32 %s696_s3, 3 }
 0x1fb   : > { %s1586_s11 = smov (!%p697_p5, %s701_s11), %s700_s10  ;;  %s1365_s13 = spop %1364 }
 0x1fc   : > { %vm686_vm5 = vcmp.eq.s32.totalorder %v45_v4, %v685_v63  ;;  %s688_s14 = scalar_lea.vmem [#allocation13], %s1338_s26  ;;  %s691_s15 = scalar_lea.vmem [#allocation14], %s1338_s26 }
 0x1fd   : > { %689 = vst.msk [vmem:[%s688_s14] sm:$0xff] %vm686_vm5, %v1398_v54  ;;  %692 = vst.msk [vmem:[%s691_s15] sm:$0xff] %vm686_vm5, %v1399_v55  ;;  %s703_s16 = sshrl.u32 %s1586_s11, 7  ;;  %s705_s17 = sand.u32 127, %s1586_s11  }
 0x1fe   : > { %s1341_s18 = sshll.u32 %s703_s16, 10  ;;  %s722_s20 = ssub.s32 0, %s1365_s13 }
 0x1ff   : > { %s706_s19 = sadd.s32 %s1341_s18, %s705_s17  ;;  %s720_s21 = sshrl.u32 %s1365_s13, 7 }
 0x200   : > { %v708_v0 = vstv %s706_s19  ;;  %s1344_s22 = smin.u32 %s1365_s13, %s722_s20  ;;  %p721_p6 = scmp.lt.s32.totalorder %s1365_s13, 0 }
 0x201   : > { %v709_v1 = vadd.s32 640, %v708_v0  ;;  %s724_s23 = sand.u32 127, %s1344_s22   ;;  %s1471_s25 = spop %1366 }
 0x202   : > { %s725_s24 = ssub.s32 0, %s724_s23  ;;  %s712_s26 = scalar_lea.vmem [#allocation13], %s1342_s12 }
 0x203   : > { %vm710_vm6 = vcmp.eq.s32.totalorder %v45_v4, %v709_v1  ;;  %s715_s27 = scalar_lea.vmem [#allocation14], %s1342_s12  ;;  %s1588_s24 = smov (!%p721_p6, %s725_s24), %s724_s23 }
 0x204   : > { %713 = vst.msk [vmem:[%s712_s26] sm:$0xff] %vm710_vm6, %v1398_v54  ;;  %716 = vst.msk [vmem:[%s715_s27] sm:$0xff] %vm710_vm6, %v1399_v55  ;;  %s1346_s29 = sshll.u32 %s720_s21, 3  ;;  %s727_s30 = sshrl.u32 %s1588_s24, 7 }
 0x205   : > { %s729_s28 = sand.u32 127, %s1588_s24   ;;  %s1345_s3 = sshll.u32 %s727_s30, 10 }
 0x206   : > { %s746_s4 = ssub.s32 0, %s1471_s25  ;;  %s730_s5 = sadd.s32 %s1345_s3, %s729_s28 }
 0x207   : > { %s1348_s6 = smin.u32 %s1471_s25, %s746_s4  ;;  %v732_v2 = vstv %s730_s5  ;;  %p745_p7 = scmp.lt.s32.totalorder %s1471_s25, 0 }
 0x208   : > { %s748_s7 = sand.u32 127, %s1348_s6   ;;  %v733_v3 = vadd.s32 768, %v732_v2  ;;  %s744_s9 = sshrl.u32 %s1471_s25, 7 }
 0x209   : > { %s749_s8 = ssub.s32 0, %s748_s7  ;;  %s736_s10 = scalar_lea.vmem [#allocation13], %s1346_s29 }
 0x20a   : > { %s1590_s8 = smov (!%p745_p7, %s749_s8), %s748_s7  ;;  %vm734_vm7 = vcmp.eq.s32.totalorder %v45_v4, %v733_v3  ;;  %s739_s11 = scalar_lea.vmem [#allocation14], %s1346_s29 }
 0x20b   : > { %737 = vst.msk [vmem:[%s736_s10] sm:$0xff] %vm734_vm7, %v1398_v54  ;;  %740 = vst.msk [vmem:[%s739_s11] sm:$0xff] %vm734_vm7, %v1399_v55  ;;  %s751_s12 = sshrl.u32 %s1590_s8, 7  ;;  %s753_s13 = sand.u32 127, %s1590_s8  }
 0x20c   : > { %s1349_s14 = sshll.u32 %s751_s12, 10  ;;  %s1350_s16 = sshll.u32 %s744_s9, 3 }
 0x20d   : > { %s754_s15 = sadd.s32 %s1349_s14, %s753_s13  ;;  %s760_s17 = scalar_lea.vmem [#allocation13], %s1350_s16 }
 0x20e   : > { %v756_v5 = vstv %s754_s15  ;;  %s763_s18 = scalar_lea.vmem [#allocation14], %s1350_s16 }
 0x20f   : > { %v757_v6 = vadd.s32 896, %v756_v5 }
 0x210   :  { %165 = sbr.rel (!%p163_p8) target bundleno = 22 (0x16), region = 176 }
 0x211   : > { %vm758_vm8 = vcmp.eq.s32.totalorder %v45_v4, %v757_v6  ;;  %v1490_v4 = vsub.s32 (%p163_p8), %v806_v16, %v1437_v11 }
 0x212   : > { %761 = vst.msk [vmem:[%s760_s17] sm:$0xff] %vm758_vm8, %v1398_v54  ;;  %764 = vst.msk [vmem:[%s763_s18] sm:$0xff] %vm758_vm8, %v1399_v55 }
 0x213   :  { %v810_v23 = vrot.slane (%p163_p8), %v791_v17, %v1490_v4  ;;  %v817_v24 = vrot.slane (%p163_p8), %v795_v19, %v1490_v4  ;;  %v991_v25 = vrot.slane (%p163_p8), %v793_v18, %v1490_v4  ;;  %v998_v27 = vrot.slane (%p163_p8), %v797_v21, %v1490_v4 }
 0x215   :  { %vm819_vm15 = vcmp.gt.s32.totalorder (%p163_p8), %v791_v17, %v810_v23  ;;  %vm820_vm0 = vcmp.eq.s32.totalorder (%p163_p8), %v791_v17, %v810_v23  ;;  %vm821_vm1 = vcmp.lt.s32.totalorder (%p163_p8), %v795_v19, %v817_v24  ;;  %vm1001_vm3 = vcmp.eq.s32.totalorder (%p163_p8), %v793_v18, %v991_v25 }
 0x216   :  { %vm822_vm2 = vmand (%p163_p8), %vm820_vm0, %vm821_vm1  ;;  %vm1002_vm4 = vcmp.lt.s32.totalorder (%p163_p8), %v797_v21, %v998_v27  ;;  %vm1000_vm6 = vcmp.gt.s32.totalorder (%p163_p8), %v793_v18, %v991_v25 }
 0x217   :  { %vm823_vm5 = vmor %vm819_vm15, %vm822_vm2 }
 0x218   :  { %vm828_vm7 = vmxor %vm823_vm5, %vm1495_vm14 }
 0x219   :  { %v829_v32 = vsel %vm828_vm7, %v791_v17, %v810_v23  ;;  %v830_v33 = vsel %vm828_vm7, %v795_v19, %v817_v24  ;;  %vm1003_vm8 = vmand %vm1001_vm3, %vm1002_vm4 }
 0x21a   :  { %v838_v35 = vrot.slane %v829_v32, %v1501_v30  ;;  %v845_v36 = vrot.slane %v830_v33, %v1501_v30  ;;  %vm1004_vm9 = vmor %vm1000_vm6, %vm1003_vm8 }
 0x21b   :  { %vm1009_vm11 = vmxor %vm1004_vm9, %vm1495_vm14 }
 0x21c   :  { %vm847_vm12 = vcmp.gt.s32.totalorder %v829_v32, %v838_v35  ;;  %vm848_vm13 = vcmp.eq.s32.totalorder %v829_v32, %v838_v35  ;;  %vm849_vm15 = vcmp.lt.s32.totalorder %v830_v33, %v845_v36  ;;  %v1010_v38 = vsel %vm1009_vm11, %v793_v18, %v991_v25 }
 0x21d   :  { %vm850_vm0 = vmand %vm848_vm13, %vm849_vm15  ;;  %v1011_v40 = vsel %vm1009_vm11, %v797_v21, %v998_v27  ;;  %v1019_v41 = vrot.slane %v1010_v38, %v1501_v30 }
 0x21e   :  { %vm851_vm1 = vmor %vm847_vm12, %vm850_vm0  ;;  %v1026_v42 = vrot.slane %v1011_v40, %v1501_v30  ;;  %vm1524_vm12 = vcmp.ne.s32.totalorder %v882_v43, 0 }
 0x21f   :  { %vm856_vm2 = vmxor %vm851_vm1, %vm1508_vm10  ;;  %vm1028_vm3 = vcmp.gt.s32.totalorder %v1010_v38, %v1019_v41  ;;  %vm1029_vm4 = vcmp.eq.s32.totalorder %v1010_v38, %v1019_v41 }
 0x220   :  { %v857_v44 = vsel %vm856_vm2, %v829_v32, %v838_v35  ;;  %v858_v45 = vsel %vm856_vm2, %v830_v33, %v845_v36  ;;  %vm1030_vm5 = vcmp.lt.s32.totalorder %v1011_v40, %v1026_v42 }
 0x221   :  { %v866_v46 = vrot.slane %v857_v44, %v1515_v39  ;;  %v873_v47 = vrot.slane %v858_v45, %v1515_v39  ;;  %vm1031_vm6 = vmand %vm1029_vm4, %vm1030_vm5 }
 0x222   :  { %vm1032_vm7 = vmor %vm1028_vm3, %vm1031_vm6 }
 0x223   :  { %vm875_vm8 = vcmp.gt.s32.totalorder %v857_v44, %v866_v46  ;;  %vm876_vm9 = vcmp.eq.s32.totalorder %v857_v44, %v866_v46  ;;  %vm877_vm11 = vcmp.lt.s32.totalorder %v858_v45, %v873_v47  ;;  %vm1037_vm13 = vmxor %vm1032_vm7, %vm1508_vm10 }
 0x224   :  { %vm878_vm15 = vmand %vm876_vm9, %vm877_vm11  ;;  %v1038_v11 = vsel %vm1037_vm13, %v1010_v38, %v1019_v41  ;;  %v1039_v49 = vsel %vm1037_vm13, %v1011_v40, %v1026_v42 }
 0x225   :  { %vm879_vm0 = vmor %vm875_vm8, %vm878_vm15  ;;  %v1047_v50 = vrot.slane %v1038_v11, %v1515_v39  ;;  %v1054_v51 = vrot.slane %v1039_v49, %v1515_v39 }
 0x226   :  { %vm884_vm1 = vmxor %vm879_vm0, %vm1524_vm12 }
 0x227   :  { %v885_v52 = vsel %vm884_vm1, %v857_v44, %v866_v46  ;;  %v886_v53 = vsel %vm884_vm1, %v858_v45, %v873_v47  ;;  %vm1056_vm2 = vcmp.gt.s32.totalorder %v1038_v11, %v1047_v50  ;;  %vm1057_vm3 = vcmp.eq.s32.totalorder %v1038_v11, %v1047_v50 }
 0x228   :  { %v900_v54 = vrot.slane %v885_v52, %v1490_v4  ;;  %v907_v55 = vrot.slane %v886_v53, %v1490_v4  ;;  %vm1058_vm4 = vcmp.lt.s32.totalorder %v1039_v49, %v1054_v51 }
 0x229   :  { %vm1059_vm5 = vmand %vm1057_vm3, %vm1058_vm4 }
 0x22a   :  { %vm909_vm6 = vcmp.gt.s32.totalorder %v885_v52, %v900_v54  ;;  %vm910_vm7 = vcmp.eq.s32.totalorder %v885_v52, %v900_v54  ;;  %vm911_vm8 = vcmp.lt.s32.totalorder %v886_v53, %v907_v55  ;;  %vm1060_vm9 = vmor %vm1056_vm2, %vm1059_vm5 }
 0x22b   :  { %vm912_vm11 = vmand %vm910_vm7, %vm911_vm8 }
 0x22c   :  { %vm913_vm13 = vmor %vm909_vm6, %vm912_vm11 }
 0x22d   :  { %vm918_vm15 = vmxor %vm913_vm13, %vm1495_vm14 }
 0x22e   :  { %v919_v56 = vsel %vm918_vm15, %v885_v52, %v900_v54  ;;  %v920_v57 = vsel %vm918_vm15, %v886_v53, %v907_v55  ;;  %vm1065_vm0 = vmxor %vm1060_vm9, %vm1524_vm12 }
 0x22f   :  { %v928_v58 = vrot.slane %v919_v56, %v1501_v30  ;;  %v935_v59 = vrot.slane %v920_v57, %v1501_v30  ;;  %v1066_v60 = vsel %vm1065_vm0, %v1038_v11, %v1047_v50  ;;  %v1067_v61 = vsel %vm1065_vm0, %v1039_v49, %v1054_v51 }
 0x230   :  { %v1081_v62 = vrot.slane %v1066_v60, %v1490_v4  ;;  %v1088_v63 = vrot.slane %v1067_v61, %v1490_v4 }
 0x231   :  { %vm937_vm1 = vcmp.gt.s32.totalorder %v919_v56, %v928_v58  ;;  %vm938_vm2 = vcmp.eq.s32.totalorder %v919_v56, %v928_v58  ;;  %vm939_vm3 = vcmp.lt.s32.totalorder %v920_v57, %v935_v59 }
 0x232   :  { %vm940_vm4 = vmand %vm938_vm2, %vm939_vm3  ;;  %vm1091_vm5 = vcmp.eq.s32.totalorder %v1066_v60, %v1081_v62  ;;  %vm1092_vm6 = vcmp.lt.s32.totalorder %v1067_v61, %v1088_v63  ;;  %vm1090_vm8 = vcmp.gt.s32.totalorder %v1066_v60, %v1081_v62 }
 0x233   :  { %vm941_vm7 = vmor %vm937_vm1, %vm940_vm4 }
 0x234   :  { %vm946_vm9 = vmxor %vm941_vm7, %vm1508_vm10 }
 0x235   :  { %v947_v0 = vsel %vm946_vm9, %v919_v56, %v928_v58  ;;  %v948_v1 = vsel %vm946_vm9, %v920_v57, %v935_v59  ;;  %vm1093_vm11 = vmand %vm1091_vm5, %vm1092_vm6 }
 0x236   :  { %v956_v2 = vrot.slane %v947_v0, %v1515_v39  ;;  %v963_v3 = vrot.slane %v948_v1, %v1515_v39  ;;  %vm1094_vm13 = vmor %vm1090_vm8, %vm1093_vm11 }
 0x237   :  { %vm1099_vm15 = vmxor %vm1094_vm13, %vm1495_vm14 }
 0x238   :  { %vm965_vm0 = vcmp.gt.s32.totalorder %v947_v0, %v956_v2  ;;  %vm966_vm2 = vcmp.eq.s32.totalorder %v947_v0, %v956_v2  ;;  %vm967_vm3 = vcmp.lt.s32.totalorder %v948_v1, %v963_v3  ;;  %v1100_v5 = vsel %vm1099_vm15, %v1066_v60, %v1081_v62 }
 0x239   :  { %vm968_vm1 = vmand %vm966_vm2, %vm967_vm3  ;;  %v1101_v6 = vsel %vm1099_vm15, %v1067_v61, %v1088_v63  ;;  %v1109_v7 = vrot.slane %v1100_v5, %v1501_v30 }
 0x23a   :  { %vm969_vm4 = vmor %vm965_vm0, %vm968_vm1  ;;  %v1116_v8 = vrot.slane %v1101_v6, %v1501_v30 }
 0x23b   :  { %vm974_vm5 = vmxor %vm969_vm4, %vm1524_vm12  ;;  %vm1118_vm6 = vcmp.gt.s32.totalorder %v1100_v5, %v1109_v7  ;;  %vm1119_vm7 = vcmp.eq.s32.totalorder %v1100_v5, %v1109_v7 }
 0x23c   :  { %v975_v9 = vsel %vm974_vm5, %v947_v0, %v956_v2  ;;  %v976_v10 = vsel %vm974_vm5, %v948_v1, %v963_v3  ;;  %vm1120_vm8 = vcmp.lt.s32.totalorder %v1101_v6, %v1116_v8 }
 0x23d   :  { %978 = vst [vmem:[#allocation9] sm:$0xff] %v975_v9  ;;  %979 = vst [vmem:[#allocation11] sm:$0xff] %v976_v10 }
 0x23e   :  { %vm1121_vm14 = vmand %vm1119_vm7, %vm1120_vm8 }
 0x23f   :  { %vm1122_vm9 = vmor %vm1118_vm6, %vm1121_vm14 }
 0x240   :  { %vm1127_vm11 = vmxor %vm1122_vm9, %vm1508_vm10 }
 0x241   :  { %v1128_v12 = vsel %vm1127_vm11, %v1100_v5, %v1109_v7  ;;  %v1129_v13 = vsel %vm1127_vm11, %v1101_v6, %v1116_v8 }
 0x242   :  { %v1137_v14 = vrot.slane %v1128_v12, %v1515_v39  ;;  %v1144_v15 = vrot.slane %v1129_v13, %v1515_v39 }
 0x244   :  { %vm1146_vm13 = vcmp.gt.s32.totalorder %v1128_v12, %v1137_v14  ;;  %vm1147_vm15 = vcmp.eq.s32.totalorder %v1128_v12, %v1137_v14  ;;  %vm1148_vm0 = vcmp.lt.s32.totalorder %v1129_v13, %v1144_v15  ;;  %v1162_v18 = vld [vmem:[#allocation9] sm:$0xff]  ;;  %v1186_v21 = vld [vmem:[#allocation11] sm:$0xff] }
 0x245   :  { %vm1149_vm2 = vmand %vm1147_vm15, %vm1148_vm0  ;;  %vm1163_vm10 = vcmp.lt.s32.totalorder %v1162_v18, 0  ;;  %v1164_v19 = vsub.s32 2147483647, %v1162_v18 }
 0x246   :  { %vm1150_vm3 = vmor %vm1146_vm13, %vm1149_vm2 }
 0x247   :  { %vm1155_vm1 = vmxor %vm1150_vm3, %vm1524_vm12  ;;  %v1165_v20 = vsel %vm1163_vm10, %v1164_v19, %v1162_v18 }
 0x248   :  { %v1156_v16 = vsel %vm1155_vm1, %v1128_v12, %v1137_v14  ;;  %v1157_v17 = vsel %vm1155_vm1, %v1129_v13, %v1144_v15  ;;  %1166 = vst [vmem:[#allocation9] sm:$0xff] %v1165_v20  ;;  %1168 = vxpose.xlu0.b32.start.end [1/1] (short) (narrow) %v1165_v20, 8 }
 0x249   :  { %1159 = vst [vmem:[#allocation10] sm:$0xff] %v1156_v16  ;;  %1160 = vst [vmem:[#allocation12] sm:$0xff] %v1157_v17 }
 0x24c   :  { %1187 = vxpose.xlu0.b32.start.end [1/1] (short) (narrow) %v1186_v21, 8 }
 0x2c8   :  { %v1169_v4 = vpop.trf.xlu0 }
 0x2c9   :  { %1233 = vst [vmem:[%s1567_s1] sm:$0xff] %v1169_v4 }
 0x2cc   :  { %v1188_v22 = vpop.trf.xlu0 }
 0x2cd   :  { %1265 = vst [vmem:[%s1568_s2] sm:$0xff] %v1188_v22 }

// kernel: _forward_impl.1
= control target key start
LH: loop header
LB: loop body
LE: loop exit
PB: predicated region body
PF: predicated region fallthrough
CT: control target
= control target key end

     0   :  { %s584_s9 = smov 0   ;;  %s716_s0 = inlined_call_operand.vmem [shape: f32[8,32], index: 0, kind: input, shape index: {}]   ;;  %s717_s1 = inlined_call_operand.vmem [shape: f32[1024,32], index: 1, kind: input, shape index: {}]   ;;  %s718_s2 = inlined_call_operand.vmem [shape: f32[8,1024], index: 2, kind: output, shape index: {}]  }
   0x1 LB: > { %s488_s10 = sadd.s32 4294967295, %s567_s9   ;;  %p492_p0 = scmp.ge.s32.totalorder %s567_s9, 1  ;;  %s567_s9 = sphi %s584_s9, %s12_s9  }
   0x2   : > { %p113_p1 = scmp.lt.s32.totalorder %s567_s9, 3 }
   0x4   : > { %p114_p2 = pnand %p492_p0, %p113_p1 }
   0x5   : > { %s493_s11 = sshll.u32 (!%p114_p2), %s488_s10, 6  ;;  %v148_v0 = vld [vmem:[%s716_s0] sm:$0xff] (!%p114_p2)  ;;  %vm246_vm0 = vcmask (!%p114_p2), 261120   ;;  %s495_s18 = sshll.u32 (!%p114_p2), %s488_s10, 2 }
   0x6   : > { %117 = sbr.rel (%p114_p2) target bundleno = 301 (0x12d), region = 28  ;;  %p136_p3 = scmp.lt.s32.totalorder (!%p114_p2), %s493_s11, 127  ;;  %v597_v1 = vpack.c.bf16 (!%p114_p2), %v148_v0, %v148_v0 }
   0x7   : > { %p142_p4 = scmp.lt.s32.totalorder (!%p114_p2), %s495_s18, 7 }
   0x8   : > { %517 = vmatprep.mubr.msk.bf16.mxu0 (!%p114_p2), %vm246_vm0, %v597_v1  ;;  %535 = vmatprep.mubr.msk.bf16.mxu1 (!%p114_p2), %vm246_vm0, %v597_v1 }
   0xd   : > { %s720_s11 = smov (!%p136_p3, %s493_s11), 127  ;;  %s722_s18 = smov (!%p142_p4, %s495_s18), 7 }
   0xe   : > { %s494_s14 = sshll.u32 %s720_s11, 3  ;;  %s496_s19 = sshll.u32 %s722_s18, 3 }
   0xf   : > { %s606_s17 = scalar_lea.vmem %s717_s1, %s494_s14  ;;  %s145_s22 = scalar_lea.vmem %s718_s2, %s496_s19 }
  0x10   : > { %v166_v2 = vld [vmem:[%s606_s17 + $0x80] sm:$0xff]  ;;  %v167_v3 = vld [vmem:[%s606_s17 + $0x88] sm:$0xff]  ;;  %v168_v13 = vld [vmem:[%s606_s17 + $0x90] sm:$0xff] }
  0x11   : > { %v198_v4 = vld [vmem:[%s606_s17 + $0x180] sm:$0xff]  ;;  %v222_v5 = vpack.c.bf16 %v167_v3, %v166_v2  ;;  %v199_v6 = vld [vmem:[%s606_s17 + $0x188] sm:$0xff]  ;;  %v169_v15 = vld [vmem:[%s606_s17 + $0x98] sm:$0xff] }
  0x12   : > { %v150_v7 = vld [vmem:[%s606_s17] sm:$0xff]  ;;  %v151_v8 = vld [vmem:[%s606_s17 + $0x8] sm:$0xff]  ;;  %v238_v9 = vpack.c.bf16 %v199_v6, %v198_v4  ;;  %v200_v16 = vld [vmem:[%s606_s17 + $0x190] sm:$0xff]  ;;  %v223_v19 = vpack.c.bf16 %v169_v15, %v168_v13 }
  0x13   : > { %v214_v10 = vpack.c.bf16 %v151_v8, %v150_v7  ;;  %v182_v11 = vld [vmem:[%s606_s17 + $0x100] sm:$0xff]  ;;  %v183_v12 = vld [vmem:[%s606_s17 + $0x108] sm:$0xff]  ;;  %537 = vmatprep.subr.msk.bf16.mxu0 %vm246_vm0, %v222_v5  ;;  %v201_v17 = vld [vmem:[%s606_s17 + $0x198] sm:$0xff] }
  0x14   : > { %v230_v14 = vpack.c.bf16 %v183_v12, %v182_v11  ;;  %545 = vmatprep.subr.msk.bf16.mxu1 %vm246_vm0, %v238_v9  ;;  %v239_v20 = vpack.c.bf16 %v201_v17, %v200_v16  ;;  %v152_v21 = vld [vmem:[%s606_s17 + $0x10] sm:$0xff]  ;;  %v153_v22 = vld [vmem:[%s606_s17 + $0x18] sm:$0xff]  ;;  %v170_v28 = vld [vmem:[%s606_s17 + $0xa0] sm:$0xff] }
  0x15   : > { %v251_v18 = vsel %vm246_vm0, %v214_v10, 0  ;;  %v184_v23 = vld [vmem:[%s606_s17 + $0x110] sm:$0xff]  ;;  %v185_v25 = vld [vmem:[%s606_s17 + $0x118] sm:$0xff]  ;;  %v215_v26 = vpack.c.bf16 %v153_v22, %v152_v21  ;;  %v171_v29 = vld [vmem:[%s606_s17 + $0xa8] sm:$0xff] }
  0x16   : > { %502 = vmatpush3.bf16.xpose.msra.mxu0 %v251_v18  ;;  %v299_v24 = vsel %vm246_vm0, %v230_v14, 0  ;;  %v231_v27 = vpack.c.bf16 %v185_v25, %v184_v23  ;;  %v202_v30 = vld [vmem:[%s606_s17 + $0x1a0] sm:$0xff]  ;;  %v203_v31 = vld [vmem:[%s606_s17 + $0x1a8] sm:$0xff]  ;;  %v224_v33 = vpack.c.bf16 %v171_v29, %v170_v28  ;;  %v172_v42 = vld [vmem:[%s606_s17 + $0xb0] sm:$0xff] }
  0x17   : > { %520 = vmatpush3.bf16.xpose.msra.mxu1 %v299_v24  ;;  %538 = vmatprep.subr.msk.bf16.mxu0 %vm246_vm0, %v223_v19  ;;  %v254_v32 = vsel %vm246_vm0, %v215_v26, 0  ;;  %v240_v35 = vpack.c.bf16 %v203_v31, %v202_v30  ;;  %v154_v36 = vld [vmem:[%s606_s17 + $0x20] sm:$0xff]  ;;  %v155_v37 = vld [vmem:[%s606_s17 + $0x28] sm:$0xff]  ;;  %v173_v43 = vld [vmem:[%s606_s17 + $0xb8] sm:$0xff] }
  0x18   : > { %546 = vmatprep.subr.msk.bf16.mxu1 %vm246_vm0, %v239_v20  ;;  %v302_v34 = vsel %vm246_vm0, %v231_v27, 0  ;;  %v186_v38 = vld [vmem:[%s606_s17 + $0x120] sm:$0xff]  ;;  %v187_v39 = vld [vmem:[%s606_s17 + $0x128] sm:$0xff]  ;;  %v216_v40 = vpack.c.bf16 %v155_v37, %v154_v36  ;;  %v204_v44 = vld [vmem:[%s606_s17 + $0x1b0] sm:$0xff]  ;;  %v225_v47 = vpack.c.bf16 %v173_v43, %v172_v42 }
  0x19   : > { %v232_v41 = vpack.c.bf16 %v187_v39, %v186_v38  ;;  %v205_v45 = vld [vmem:[%s606_s17 + $0x1b8] sm:$0xff]  ;;  %v156_v50 = vld [vmem:[%s606_s17 + $0x30] sm:$0xff]  ;;  %v174_v56 = vld [vmem:[%s606_s17 + $0xc0] sm:$0xff] }
  0x1a   : > { %v257_v46 = vsel %vm246_vm0, %v216_v40, 0  ;;  %v241_v49 = vpack.c.bf16 %v205_v45, %v204_v44  ;;  %v157_v51 = vld [vmem:[%s606_s17 + $0x38] sm:$0xff]  ;;  %v188_v52 = vld [vmem:[%s606_s17 + $0x130] sm:$0xff]  ;;  %v175_v57 = vld [vmem:[%s606_s17 + $0xc8] sm:$0xff] }
  0x1b   : > { %v305_v48 = vsel %vm246_vm0, %v232_v41, 0  ;;  %v189_v53 = vld [vmem:[%s606_s17 + $0x138] sm:$0xff]  ;;  %v217_v54 = vpack.c.bf16 %v157_v51, %v156_v50  ;;  %v206_v58 = vld [vmem:[%s606_s17 + $0x1c0] sm:$0xff]  ;;  %v207_v59 = vld [vmem:[%s606_s17 + $0x1c8] sm:$0xff]  ;;  %v226_v61 = vpack.c.bf16 %v175_v57, %v174_v56 }
  0x1c   : > { %v233_v55 = vpack.c.bf16 %v189_v53, %v188_v52  ;;  %v242_v63 = vpack.c.bf16 %v207_v59, %v206_v58  ;;  %v158_v0 = vld [vmem:[%s606_s17 + $0x40] sm:$0xff]  ;;  %v159_v2 = vld [vmem:[%s606_s17 + $0x48] sm:$0xff]  ;;  %v176_v7 = vld [vmem:[%s606_s17 + $0xd0] sm:$0xff] }
  0x1d   : > { %v260_v60 = vsel %vm246_vm0, %v217_v54, 0  ;;  %v190_v3 = vld [vmem:[%s606_s17 + $0x140] sm:$0xff]  ;;  %v191_v4 = vld [vmem:[%s606_s17 + $0x148] sm:$0xff]  ;;  %v218_v5 = vpack.c.bf16 %v159_v2, %v158_v0  ;;  %v177_v8 = vld [vmem:[%s606_s17 + $0xd8] sm:$0xff] }
  0x1e   : > { %504 = vmatpush3.bf16.xpose.msra.mxu0 %v254_v32  ;;  %v308_v62 = vsel %vm246_vm0, %v233_v55, 0  ;;  %v234_v6 = vpack.c.bf16 %v191_v4, %v190_v3  ;;  %v208_v9 = vld [vmem:[%s606_s17 + $0x1d0] sm:$0xff]  ;;  %v209_v10 = vld [vmem:[%s606_s17 + $0x1d8] sm:$0xff]  ;;  %v227_v12 = vpack.c.bf16 %v177_v8, %v176_v7  ;;  %v178_v21 = vld [vmem:[%s606_s17 + $0xe0] sm:$0xff] }
  0x1f   : > { %522 = vmatpush3.bf16.xpose.msra.mxu1 %v302_v34  ;;  %539 = vmatprep.subr.msk.bf16.mxu0 %vm246_vm0, %v224_v33  ;;  %v263_v11 = vsel %vm246_vm0, %v218_v5, 0  ;;  %v243_v14 = vpack.c.bf16 %v209_v10, %v208_v9  ;;  %v160_v15 = vld [vmem:[%s606_s17 + $0x50] sm:$0xff]  ;;  %v161_v16 = vld [vmem:[%s606_s17 + $0x58] sm:$0xff]  ;;  %v179_v22 = vld [vmem:[%s606_s17 + $0xe8] sm:$0xff] }
  0x20   : > { %547 = vmatprep.subr.msk.bf16.mxu1 %vm246_vm0, %v240_v35  ;;  %v311_v13 = vsel %vm246_vm0, %v234_v6, 0  ;;  %v192_v17 = vld [vmem:[%s606_s17 + $0x150] sm:$0xff]  ;;  %v193_v18 = vld [vmem:[%s606_s17 + $0x158] sm:$0xff]  ;;  %v219_v19 = vpack.c.bf16 %v161_v16, %v160_v15  ;;  %v210_v23 = vld [vmem:[%s606_s17 + $0x1e0] sm:$0xff]  ;;  %v228_v26 = vpack.c.bf16 %v179_v22, %v178_v21 }
  0x21   : > { %v235_v20 = vpack.c.bf16 %v193_v18, %v192_v17  ;;  %v211_v24 = vld [vmem:[%s606_s17 + $0x1e8] sm:$0xff]  ;;  %v162_v29 = vld [vmem:[%s606_s17 + $0x60] sm:$0xff]  ;;  %v180_v35 = vld [vmem:[%s606_s17 + $0xf0] sm:$0xff] }
  0x22   : > { %v266_v25 = vsel %vm246_vm0, %v219_v19, 0  ;;  %v244_v28 = vpack.c.bf16 %v211_v24, %v210_v23  ;;  %v163_v30 = vld [vmem:[%s606_s17 + $0x68] sm:$0xff]  ;;  %v194_v31 = vld [vmem:[%s606_s17 + $0x160] sm:$0xff]  ;;  %v181_v36 = vld [vmem:[%s606_s17 + $0xf8] sm:$0xff] }
  0x23   : > { %v314_v27 = vsel %vm246_vm0, %v235_v20, 0  ;;  %v195_v32 = vld [vmem:[%s606_s17 + $0x168] sm:$0xff]  ;;  %v220_v33 = vpack.c.bf16 %v163_v30, %v162_v29  ;;  %v212_v37 = vld [vmem:[%s606_s17 + $0x1f0] sm:$0xff]  ;;  %v213_v38 = vld [vmem:[%s606_s17 + $0x1f8] sm:$0xff]  ;;  %v229_v40 = vpack.c.bf16 %v181_v36, %v180_v35 }
  0x24   : > { %v236_v34 = vpack.c.bf16 %v195_v32, %v194_v31  ;;  %v245_v42 = vpack.c.bf16 %v213_v38, %v212_v37  ;;  %v164_v43 = vld [vmem:[%s606_s17 + $0x70] sm:$0xff]  ;;  %v165_v44 = vld [vmem:[%s606_s17 + $0x78] sm:$0xff] }
  0x25   : > { %v269_v39 = vsel %vm246_vm0, %v220_v33, 0  ;;  %v196_v45 = vld [vmem:[%s606_s17 + $0x170] sm:$0xff] }
  0x26   : > { %506 = vmatpush3.bf16.xpose.msra.mxu0 %v257_v46  ;;  %v317_v41 = vsel %vm246_vm0, %v236_v34, 0  ;;  %v197_v46 = vld [vmem:[%s606_s17 + $0x178] sm:$0xff] }
  0x27   : > { %524 = vmatpush3.bf16.xpose.msra.mxu1 %v305_v48  ;;  %540 = vmatprep.subr.msk.bf16.mxu0 %vm246_vm0, %v225_v47  ;;  %v221_v47 = vpack.c.bf16 %v165_v44, %v164_v43  ;;  %v237_v48 = vpack.c.bf16 %v197_v46, %v196_v45 }
  0x28   : > { %548 = vmatprep.subr.msk.bf16.mxu1 %vm246_vm0, %v241_v49 }
  0x29   : > { %v272_v49 = vsel %vm246_vm0, %v221_v47, 0  ;;  %v320_v50 = vsel %vm246_vm0, %v237_v48, 0 }
  0x2e   : > { %508 = vmatpush3.bf16.xpose.msra.mxu0 %v260_v60 }
  0x2f   : > { %526 = vmatpush3.bf16.xpose.msra.mxu1 %v308_v62  ;;  %541 = vmatprep.subr.msk.bf16.mxu0 %vm246_vm0, %v226_v61 }
  0x30   : > { %549 = vmatprep.subr.msk.bf16.mxu1 %vm246_vm0, %v242_v63 }
  0x36   : > { %510 = vmatpush3.bf16.xpose.msra.mxu0 %v263_v11 }
  0x37   : > { %528 = vmatpush3.bf16.xpose.msra.mxu1 %v311_v13  ;;  %542 = vmatprep.subr.msk.bf16.mxu0 %vm246_vm0, %v227_v12 }
  0x38   : > { %550 = vmatprep.subr.msk.bf16.mxu1 %vm246_vm0, %v243_v14 }
  0x3e   : > { %512 = vmatpush3.bf16.xpose.msra.mxu0 %v266_v25 }
  0x3f   : > { %530 = vmatpush3.bf16.xpose.msra.mxu1 %v314_v27  ;;  %543 = vmatprep.subr.msk.bf16.mxu0 %vm246_vm0, %v228_v26 }
  0x40   : > { %551 = vmatprep.subr.msk.bf16.mxu1 %vm246_vm0, %v244_v28 }
  0x46   : > { %514 = vmatpush3.bf16.xpose.msra.mxu0 %v269_v39 }
  0x47   : > { %532 = vmatpush3.bf16.xpose.msra.mxu1 %v317_v41  ;;  %544 = vmatprep.subr.msk.bf16.mxu0 %vm246_vm0, %v229_v40 }
  0x48   : > { %552 = vmatprep.subr.msk.bf16.mxu1 %vm246_vm0, %v245_v42 }
  0x4e   : > { %516 = vmatpush3.bf16.xpose.msra.mxu0 %v272_v49 }
  0x4f   : > { %534 = vmatpush3.bf16.xpose.msra.mxu1 %v320_v50 }
  0x55   : > { %518 = vmatmul.mubr.msk.bf16.vlgmr.msra.gmra.mrb[0].mxu0 %vm246_vm0, %v597_v1 }
  0x56   : > { %536 = vmatmul.mubr.msk.bf16.vlgmr.msra.gmra.mrb[0].mxu1 %vm246_vm0, %v597_v1 }
 0x128   : > { %v380_v51 = vpop.f32.mrb[0].mxu0 }
 0x129   : > { %428 = vst [vmem:[%s145_s22] sm:$0xff] %v380_v51  ;;  %v421_v52 = vpop.f32.mrb[0].mxu1  ;;  %v382_v53 = vpop.f32.mrb[1].mxu0 }
 0x12a   : > { %429 = vst [vmem:[%s145_s22 + $0x8] sm:$0xff] %v382_v53  ;;  %v423_v54 = vpop.f32.mrb[1].mxu1  ;;  %v384_v55 = vpop.f32.mrb[2].mxu0  ;;  %430 = vst [vmem:[%s145_s22 + $0x10] sm:$0xff] %v421_v52 }
 0x12b   : > { %v425_v56 = vpop.f32.mrb[2].mxu1  ;;  %v385_v57 = vpop.f32.mrb[3].mxu0  ;;  %431 = vst [vmem:[%s145_s22 + $0x18] sm:$0xff] %v423_v54 }
 0x12c   : > { %v426_v1 = vpop.f32.mrb[3].mxu1 }
 0x12d PF: > { %s12_s9 = sadd.s32 1, %s567_s9  }
 0x12e   : > { %p9_p5 = scmp.ge.s32.totalorder %s12_s9, 4  }
 0x130   :  { %11 = sbr.rel (!%p9_p5) target bundleno = 1 (0x1), region = 58 }

</bundles_post_ra>
